<compile_context>
chip_gen: v7x
topology: tpu7x:2x2x1
jax: 0.10.0
libtpu: 0.0.40
codegen_flags: <defaults>
</compile_context>

<pallas_src>
import functools

import jax
import jax.numpy as jnp
from jax import lax
from jax.experimental import pallas as pl
from jax.experimental.pallas import tpu as pltpu

# ---- small synthetic CLIP-text-encoder hyperparameters -----------------------
VOCAB = 64        # real CLIP: 49408
CONTEXT = 8       # real CLIP: 77
WIDTH = 32        # real CLIP: 512
HEADS = 2         # real CLIP: 8
LAYERS = 2        # real CLIP: 12
EMBED_DIM = 32    # real CLIP: 512
HEAD_DIM = WIDTH // HEADS
MLP_DIM = 4 * WIDTH
LN_EPS = 1e-5
NEG_INF = -1e30


# ---------------------------- fused kernel -----------------------------------
def _layernorm(x, g, b):
    mu = jnp.mean(x, axis=-1, keepdims=True)
    xc = x - mu
    var = jnp.mean(xc * xc, axis=-1, keepdims=True)
    return xc * lax.rsqrt(var + LN_EPS) * g + b


def _text_tower_kernel(
    x0_ref,                        # (N*L, D) f32  token + positional embedding
    ln1_g_ref, ln1_b_ref,          # (1, 1, D) f32
    w_qkv_ref, b_qkv_ref,          # (1, D, 3D) bf16 / (1, 1, 3D) f32
    w_o_ref, b_o_ref,              # (1, D, D) bf16 / (1, 1, D) f32
    ln2_g_ref, ln2_b_ref,          # (1, 1, D) f32
    w_fc1_ref, b_fc1_ref,          # (1, D, 4D) bf16 / (1, 1, 4D) f32
    w_fc2_ref, b_fc2_ref,          # (1, 4D, D) bf16 / (1, 1, D) f32
    lnf_g_ref, lnf_b_ref,          # (1, D) f32
    eot_sel_ref,                   # (N, N*L) f32 one-hot EOT row selector
    w_proj_ref,                    # (D, E) bf16
    out_ref,                       # (N, E) f32
    x_acc,                         # VMEM scratch (N*L, D) f32 residual stream
    *, n_cls, seq_len, heads, head_dim,
):
    layer = pl.program_id(0)

    @pl.when(layer == 0)
    def _():
        x_acc[...] = x0_ref[...]

    x = x_acc[...]                                   # (NL, D) f32
    d = x.shape[-1]
    scale = head_dim ** -0.5

    # ---------------- attention branch (pre-LN, fused QKV, causal MHA) -------
    h = _layernorm(x, ln1_g_ref[0], ln1_b_ref[0])
    qkv = jnp.dot(h.astype(jnp.bfloat16), w_qkv_ref[0],
                  preferred_element_type=jnp.float32) + b_qkv_ref[0]
    q = qkv[:, 0 * d:1 * d]
    k = qkv[:, 1 * d:2 * d]
    v = qkv[:, 2 * d:3 * d]

    ri = lax.broadcasted_iota(jnp.int32, (seq_len, seq_len), 0)
    ci = lax.broadcasted_iota(jnp.int32, (seq_len, seq_len), 1)
    causal = ci <= ri

    attn_rows = []
    for n in range(n_cls):                 # static unroll: tiny N, HEADS
        r0 = n * seq_len
        head_outs = []
        for hh in range(heads):
            c0 = hh * head_dim
            qh = q[r0:r0 + seq_len, c0:c0 + head_dim].astype(jnp.bfloat16)
            kh = k[r0:r0 + seq_len, c0:c0 + head_dim].astype(jnp.bfloat16)
            vh = v[r0:r0 + seq_len, c0:c0 + head_dim].astype(jnp.bfloat16)
            # s = q @ k^T via "NT" contraction (no explicit transpose).
            s = lax.dot_general(qh, kh, (((1,), (1,)), ((), ())),
                                preferred_element_type=jnp.float32) * scale
            s = jnp.where(causal, s, NEG_INF)        # CLIP additive causal mask
            s = s - jnp.max(s, axis=-1, keepdims=True)
            p = jnp.exp(s)                            # softmax kept in f32
            p = p * pl.reciprocal(jnp.sum(p, axis=-1, keepdims=True),
                                  approx=True)
            head_outs.append(jnp.dot(p.astype(jnp.bfloat16), vh,
                                     preferred_element_type=jnp.float32))
        attn_rows.append(jnp.concatenate(head_outs, axis=-1))   # (L, D)
    a = jnp.concatenate(attn_rows, axis=0)                       # (NL, D)

    a = jnp.dot(a.astype(jnp.bfloat16), w_o_ref[0],
                preferred_element_type=jnp.float32) + b_o_ref[0]
    x = x + a

    # ---------------- MLP branch (pre-LN, QuickGELU) -------------------------
    h = _layernorm(x, ln2_g_ref[0], ln2_b_ref[0])
    h = jnp.dot(h.astype(jnp.bfloat16), w_fc1_ref[0],
                preferred_element_type=jnp.float32) + b_fc1_ref[0]
    h = h * jax.nn.sigmoid(1.702 * h)                # QuickGELU in f32
    h = jnp.dot(h.astype(jnp.bfloat16), w_fc2_ref[0],
                preferred_element_type=jnp.float32) + b_fc2_ref[0]
    x = x + h

    x_acc[...] = x                                   # carry residual stream

    # -------- final LN + EOT gather + text projection (last layer only) ------
    @pl.when(layer == pl.num_programs(0) - 1)
    def _():
        xf = _layernorm(x, lnf_g_ref[...], lnf_b_ref[...])       # (NL, D) f32
        # EOT-token gather expressed as a one-hot row-selection matmul (f32).
        x_eot = jnp.dot(eot_sel_ref[...], xf,
                        preferred_element_type=jnp.float32)      # (N, D)
        feats = jnp.dot(x_eot.astype(jnp.bfloat16), w_proj_ref[...],
                        preferred_element_type=jnp.float32)      # (N, E)
        out_ref[...] = feats


# ---------------------------- wrapper -----------------------------------------
def class_encoder_forward(tokens, params):
    """Equivalent of clip_model.encode_text(tokens).permute(1, 0).float()."""
    N, L = tokens.shape
    D, E, F = WIDTH, EMBED_DIM, MLP_DIM
    NL = N * L
    p = params

    # Token-embedding gather + positional add stay in XLA (single tiny gather);
    # everything downstream is one fused Pallas kernel over the layer grid.
    x0 = jnp.take(p["token_embedding"], tokens, axis=0)
    x0 = (x0 + p["positional_embedding"][None, :, :]).reshape(NL, D)
    x0 = x0.astype(jnp.float32)

    # EOT token = highest token id (as in CLIP); one-hot (N, NL) row selector.
    eot = jnp.argmax(tokens, axis=-1)
    eot_sel = (jnp.arange(NL, dtype=jnp.int32)[None, :]
               == (jnp.arange(N, dtype=jnp.int32) * L + eot)[:, None]
               ).astype(jnp.float32)

    per_layer = lambda l: (l, 0, 0)
    fixed2 = lambda l: (0, 0)

    kernel = functools.partial(_text_tower_kernel, n_cls=N, seq_len=L,
                               heads=HEADS, head_dim=HEAD_DIM)

    args = (x0,
            p["ln1_g"], p["ln1_b"], p["w_qkv"], p["b_qkv"],
            p["w_o"], p["b_o"], p["ln2_g"], p["ln2_b"],
            p["w_fc1"], p["b_fc1"], p["w_fc2"], p["b_fc2"],
            p["lnf_g"], p["lnf_b"], eot_sel, p["text_projection"])

    # Advisory cost estimate for the XLA scheduler.
    attn_flops = N * HEADS * 2 * (2 * L * L * HEAD_DIM)
    layer_flops = (2 * NL * D * 3 * D) + attn_flops + (2 * NL * D * D) \
        + 2 * (2 * NL * D * F)
    flops = int(LAYERS * layer_flops + 2 * N * NL * D + 2 * N * D * E)
    transcendentals = int(LAYERS * (N * HEADS * L * L + NL * F))
    bytes_accessed = int(sum(a.size * a.dtype.itemsize for a in args) + N * E * 4)

    grid_spec = pltpu.PrefetchScalarGridSpec(
        num_scalar_prefetch=0,
        grid=(LAYERS,),
        in_specs=[
            pl.BlockSpec((NL, D), fixed2),            # x0 (residual init)
            pl.BlockSpec((1, 1, D), per_layer),       # ln1_g
            pl.BlockSpec((1, 1, D), per_layer),       # ln1_b
            pl.BlockSpec((1, D, 3 * D), per_layer),   # w_qkv (bf16)
            pl.BlockSpec((1, 1, 3 * D), per_layer),   # b_qkv
            pl.BlockSpec((1, D, D), per_layer),       # w_o   (bf16)
            pl.BlockSpec((1, 1, D), per_layer),       # b_o
            pl.BlockSpec((1, 1, D), per_layer),       # ln2_g
            pl.BlockSpec((1, 1, D), per_layer),       # ln2_b
            pl.BlockSpec((1, D, F), per_layer),       # w_fc1 (bf16)
            pl.BlockSpec((1, 1, F), per_layer),       # b_fc1
            pl.BlockSpec((1, F, D), per_layer),       # w_fc2 (bf16)
            pl.BlockSpec((1, 1, D), per_layer),       # b_fc2
            pl.BlockSpec((1, D), fixed2),             # lnf_g
            pl.BlockSpec((1, D), fixed2),             # lnf_b
            pl.BlockSpec((N, NL), fixed2),            # eot_sel
            pl.BlockSpec((D, E), fixed2),             # text_projection (bf16)
        ],
        out_specs=pl.BlockSpec((N, E), fixed2),
        scratch_shapes=[pltpu.VMEM((NL, D), jnp.float32)],
    )

    feats = pl.pallas_call(
        kernel,
        out_shape=jax.ShapeDtypeStruct((N, E), jnp.float32),
        grid_spec=grid_spec,
        compiler_params=pltpu.CompilerParams(
            dimension_semantics=("arbitrary",),       # layer loop is sequential
            vmem_limit_bytes=32 * 1024 * 1024,
        ),
        cost_estimate=pl.CostEstimate(flops=flops,
                                      transcendentals=transcendentals,
                                      bytes_accessed=bytes_accessed),
    )(*args)

    # matches .permute(1, 0).float(); tiny (N, E) transpose left to XLA.
    return feats.T.astype(jnp.float32)


# ---------------------------- params / tokenizer ------------------------------
def tokenize(classes, context_length=CONTEXT):
    # TODO(synk): the real CLIP BPE tokenizer needs its merges file; use a
    # deterministic per-character hash as a stand-in with SOT/EOT framing.
    sot, eot = VOCAB - 2, VOCAB - 1
    out = []
    for c in classes:
        ids = [sot] + [1 + (ord(ch) * 7) % (VOCAB - 3)
                       for ch in c][: context_length - 2] + [eot]
        ids = ids + [0] * (context_length - len(ids))
        out.append(ids)
    return jnp.array(out, dtype=jnp.int32)


def init_params(key):
    def nrm(k, shape, scale=0.02):
        return (scale * jax.random.normal(k, shape)).astype(jnp.float32)

    D, E, F = WIDTH, EMBED_DIM, MLP_DIM
    ks = jax.random.split(key, 8)
    params = {
        "token_embedding": nrm(ks[0], (VOCAB, D)),
        "positional_embedding": nrm(ks[1], (CONTEXT, D), 0.01),
        "lnf_g": jnp.ones((1, D), jnp.float32),
        "lnf_b": jnp.zeros((1, D), jnp.float32),
        "text_projection": nrm(ks[2], (D, E), D ** -0.5).astype(jnp.bfloat16),
        # per-layer weights stacked along a leading LAYERS axis;
        # matmul weights stored bf16 (f32 accumulation in the kernel).
        "ln1_g": jnp.ones((LAYERS, 1, D), jnp.float32),
        "ln1_b": jnp.zeros((LAYERS, 1, D), jnp.float32),
        "ln2_g": jnp.ones((LAYERS, 1, D), jnp.float32),
        "ln2_b": jnp.zeros((LAYERS, 1, D), jnp.float32),
        "w_qkv": nrm(ks[3], (LAYERS, D, 3 * D)).astype(jnp.bfloat16),
        "b_qkv": jnp.zeros((LAYERS, 1, 3 * D), jnp.float32),
        "w_o": nrm(ks[4], (LAYERS, D, D)).astype(jnp.bfloat16),
        "b_o": jnp.zeros((LAYERS, 1, D), jnp.float32),
        "w_fc1": nrm(ks[5], (LAYERS, D, F)).astype(jnp.bfloat16),
        "b_fc1": jnp.zeros((LAYERS, 1, F), jnp.float32),
        "w_fc2": nrm(ks[6], (LAYERS, F, D)).astype(jnp.bfloat16),
        "b_fc2": jnp.zeros((LAYERS, 1, D), jnp.float32),
    }
    return params


if __name__ == "__main__":
    classes = ["cat", "dog"]                       # N = 2 classes
    tokens = tokenize(classes)                     # (2, 8) int32
    params = init_params(jax.random.PRNGKey(0))

    fwd = jax.jit(class_encoder_forward)
    text_features = jax.block_until_ready(fwd(tokens, params))

    assert text_features.shape == (EMBED_DIM, len(classes))
    assert text_features.dtype == jnp.float32
    assert bool(jnp.all(jnp.isfinite(text_features)))
    print("KERNEL_OK")
</pallas_src>

<mosaic_0001>
module attributes {stable_mosaic.version = 11 : i64} {
  func.func @_text_tower_kernel(%arg0: i32, %arg1: memref<16x32xf32, #tpu.memory_space<vmem>>, %arg2: memref<1x1x32xf32, #tpu.memory_space<vmem>>, %arg3: memref<1x1x32xf32, #tpu.memory_space<vmem>>, %arg4: memref<1x32x96xbf16, #tpu.memory_space<vmem>>, %arg5: memref<1x1x96xf32, #tpu.memory_space<vmem>>, %arg6: memref<1x32x32xbf16, #tpu.memory_space<vmem>>, %arg7: memref<1x1x32xf32, #tpu.memory_space<vmem>>, %arg8: memref<1x1x32xf32, #tpu.memory_space<vmem>>, %arg9: memref<1x1x32xf32, #tpu.memory_space<vmem>>, %arg10: memref<1x32x128xbf16, #tpu.memory_space<vmem>>, %arg11: memref<1x1x128xf32, #tpu.memory_space<vmem>>, %arg12: memref<1x128x32xbf16, #tpu.memory_space<vmem>>, %arg13: memref<1x1x32xf32, #tpu.memory_space<vmem>>, %arg14: memref<1x32xf32, #tpu.memory_space<vmem>>, %arg15: memref<1x32xf32, #tpu.memory_space<vmem>>, %arg16: memref<2x16xf32, #tpu.memory_space<vmem>>, %arg17: memref<32x32xbf16, #tpu.memory_space<vmem>>, %arg18: memref<2x32xf32, #tpu.memory_space<vmem>>, %arg19: memref<16x32xf32, #tpu.memory_space<vmem>>) attributes {dimension_semantics = [#tpu.dimension_semantics<arbitrary>], iteration_bounds = array<i64: 2>, scalar_prefetch = 0 : i64, scratch_operands = 1 : i64, tpu.core_type = #tpu.core_type<tc>, window_params = [{pipeline_mode = #tpu.pipeline_mode<synchronous>, transform_indices = @transform_0, window_bounds = array<i64: 16, 32>}, {transform_indices = @transform_1, window_bounds = array<i64: 1, 1, 32>}, {transform_indices = @transform_2, window_bounds = array<i64: 1, 1, 32>}, {transform_indices = @transform_3, window_bounds = array<i64: 1, 32, 96>}, {transform_indices = @transform_4, window_bounds = array<i64: 1, 1, 96>}, {transform_indices = @transform_5, window_bounds = array<i64: 1, 32, 32>}, {transform_indices = @transform_6, window_bounds = array<i64: 1, 1, 32>}, {transform_indices = @transform_7, window_bounds = array<i64: 1, 1, 32>}, {transform_indices = @transform_8, window_bounds = array<i64: 1, 1, 32>}, {transform_indices = @transform_9, window_bounds = array<i64: 1, 32, 128>}, {transform_indices = @transform_10, window_bounds = array<i64: 1, 1, 128>}, {transform_indices = @transform_11, window_bounds = array<i64: 1, 128, 32>}, {transform_indices = @transform_12, window_bounds = array<i64: 1, 1, 32>}, {pipeline_mode = #tpu.pipeline_mode<synchronous>, transform_indices = @transform_13, window_bounds = array<i64: 1, 32>}, {pipeline_mode = #tpu.pipeline_mode<synchronous>, transform_indices = @transform_14, window_bounds = array<i64: 1, 32>}, {pipeline_mode = #tpu.pipeline_mode<synchronous>, transform_indices = @transform_15, window_bounds = array<i64: 2, 16>}, {pipeline_mode = #tpu.pipeline_mode<synchronous>, transform_indices = @transform_16, window_bounds = array<i64: 32, 32>}, {pipeline_mode = #tpu.pipeline_mode<synchronous>, transform_indices = @transform_17, window_bounds = array<i64: 2, 32>}]} {
    %c0_i32 = arith.constant 0 : i32
    %0 = arith.cmpi eq, %arg0, %c0_i32 : i32
    %1 = arith.extui %0 : i1 to i32
    %c0_i32_0 = arith.constant 0 : i32
    %2 = arith.cmpi ne, %1, %c0_i32_0 : i32
    scf.if %2 {
      %c0_80 = arith.constant 0 : index
      %c0_81 = arith.constant 0 : index
      %199 = vector.load %arg1[%c0_80, %c0_81] : memref<16x32xf32, #tpu.memory_space<vmem>>, vector<16x32xf32>
      %c0_82 = arith.constant 0 : index
      %c0_83 = arith.constant 0 : index
      %200 = vector.load %arg19[%c0_82, %c0_83] : memref<16x32xf32, #tpu.memory_space<vmem>>, vector<16x32xf32>
      tpu.vector_store %arg19[%c0_82, %c0_83], %199 {strides = array<i32>} : memref<16x32xf32, #tpu.memory_space<vmem>>, vector<16x32xf32>,
    } else {
    }
    %c0 = arith.constant 0 : index
    %c0_1 = arith.constant 0 : index
    %3 = vector.load %arg19[%c0, %c0_1] : memref<16x32xf32, #tpu.memory_space<vmem>>, vector<16x32xf32>
    %c0_2 = arith.constant 0 : index
    %c0_3 = arith.constant 0 : index
    %c0_4 = arith.constant 0 : index
    %4 = vector.load %arg2[%c0_2, %c0_3, %c0_4] : memref<1x1x32xf32, #tpu.memory_space<vmem>>, vector<1x1x32xf32>
    %5 = vector.shape_cast %4 : vector<1x1x32xf32> to vector<1x32xf32>
    %c0_5 = arith.constant 0 : index
    %c0_6 = arith.constant 0 : index
    %c0_7 = arith.constant 0 : index
    %6 = vector.load %arg3[%c0_5, %c0_6, %c0_7] : memref<1x1x32xf32, #tpu.memory_space<vmem>>, vector<1x1x32xf32>
    %7 = vector.shape_cast %6 : vector<1x1x32xf32> to vector<1x32xf32>
    %cst = arith.constant dense<0.000000e+00> : vector<16xf32>
    %8 = vector.multi_reduction <add>, %3, %cst [1] : vector<16x32xf32> to vector<16xf32>
    %9 = vector.shape_cast %8 : vector<16xf32> to vector<16x1xf32>
    %cst_8 = arith.constant 3.200000e+01 : f32
    %10 = vector.broadcast %cst_8 : f32 to vector<16x1xf32>
    %11 = arith.divf %9, %10 : vector<16x1xf32>
    %12 = vector.broadcast %11 : vector<16x1xf32> to vector<16x32xf32>
    %13 = arith.subf %3, %12 : vector<16x32xf32>
    %14 = arith.mulf %13, %13 : vector<16x32xf32>
    %cst_9 = arith.constant dense<0.000000e+00> : vector<16xf32>
    %15 = vector.multi_reduction <add>, %14, %cst_9 [1] : vector<16x32xf32> to vector<16xf32>
    %16 = vector.shape_cast %15 : vector<16xf32> to vector<16x1xf32>
    %cst_10 = arith.constant 3.200000e+01 : f32
    %17 = vector.broadcast %cst_10 : f32 to vector<16x1xf32>
    %18 = arith.divf %16, %17 : vector<16x1xf32>
    %cst_11 = arith.constant 9.99999974E-6 : f32
    %19 = vector.broadcast %cst_11 : f32 to vector<16x1xf32>
    %20 = arith.addf %18, %19 : vector<16x1xf32>
    %21 = math.rsqrt %20 : vector<16x1xf32>
    %22 = vector.broadcast %21 : vector<16x1xf32> to vector<16x32xf32>
    %23 = arith.mulf %13, %22 : vector<16x32xf32>
    %24 = vector.broadcast %5 : vector<1x32xf32> to vector<16x32xf32>
    %25 = arith.mulf %23, %24 : vector<16x32xf32>
    %26 = vector.broadcast %7 : vector<1x32xf32> to vector<16x32xf32>
    %27 = arith.addf %25, %26 : vector<16x32xf32>
    %28 = arith.truncf %27 : vector<16x32xf32> to vector<16x32xbf16>
    %c0_12 = arith.constant 0 : index
    %c0_13 = arith.constant 0 : index
    %c0_14 = arith.constant 0 : index
    %29 = vector.load %arg4[%c0_12, %c0_13, %c0_14] : memref<1x32x96xbf16, #tpu.memory_space<vmem>>, vector<1x32x96xbf16>
    %30 = vector.shape_cast %29 : vector<1x32x96xbf16> to vector<32x96xbf16>
    %cst_15 = arith.constant dense<0.000000e+00> : vector<16x96xf32>
    %31 = tpu.matmul %28, %30, %cst_15 {dimension_numbers = #tpu.dot_dimension_numbers<[1], [0], [0], [1], [0, 0, 1, 1], [], []>} : vector<16x32xbf16>, vector<32x96xbf16>, vector<16x96xf32> -> vector<16x96xf32>
    %c0_16 = arith.constant 0 : index
    %c0_17 = arith.constant 0 : index
    %c0_18 = arith.constant 0 : index
    %32 = vector.load %arg5[%c0_16, %c0_17, %c0_18] : memref<1x1x96xf32, #tpu.memory_space<vmem>>, vector<1x1x96xf32>
    %33 = vector.shape_cast %32 : vector<1x1x96xf32> to vector<1x96xf32>
    %34 = vector.broadcast %33 : vector<1x96xf32> to vector<16x96xf32>
    %35 = arith.addf %31, %34 : vector<16x96xf32>
    %36 = vector.extract_strided_slice %35 {offsets = [0, 0], sizes = [16, 32], strides = [1, 1]} : vector<16x96xf32> to vector<16x32xf32>
    %37 = vector.extract_strided_slice %35 {offsets = [0, 32], sizes = [16, 32], strides = [1, 1]} : vector<16x96xf32> to vector<16x32xf32>
    %38 = vector.extract_strided_slice %35 {offsets = [0, 64], sizes = [16, 32], strides = [1, 1]} : vector<16x96xf32> to vector<16x32xf32>
    %39 = tpu.iota {dimensions = array<i32: 0>} : vector<8x8xi32>
    %40 = tpu.iota {dimensions = array<i32: 1>} : vector<8x8xi32>
    %41 = arith.cmpi sle, %40, %39 : vector<8x8xi32>
    %42 = vector.extract_strided_slice %36 {offsets = [0, 0], sizes = [8, 16], strides = [1, 1]} : vector<16x32xf32> to vector<8x16xf32>
    %43 = arith.truncf %42 : vector<8x16xf32> to vector<8x16xbf16>
    %44 = vector.extract_strided_slice %37 {offsets = [0, 0], sizes = [8, 16], strides = [1, 1]} : vector<16x32xf32> to vector<8x16xf32>
    %45 = arith.truncf %44 : vector<8x16xf32> to vector<8x16xbf16>
    %46 = vector.extract_strided_slice %38 {offsets = [0, 0], sizes = [8, 16], strides = [1, 1]} : vector<16x32xf32> to vector<8x16xf32>
    %47 = arith.truncf %46 : vector<8x16xf32> to vector<8x16xbf16>
    %cst_19 = arith.constant dense<0.000000e+00> : vector<8x8xf32>
    %48 = tpu.matmul %43, %45, %cst_19 {dimension_numbers = #tpu.dot_dimension_numbers<[1], [1], [0], [0], [0, 0, 1, 0], [], []>} : vector<8x16xbf16>, vector<8x16xbf16>, vector<8x8xf32> -> vector<8x8xf32>
    %cst_20 = arith.constant 2.500000e-01 : f32
    %49 = vector.broadcast %cst_20 : f32 to vector<8x8xf32>
    %50 = arith.mulf %48, %49 : vector<8x8xf32>
    %cst_21 = arith.constant -1.000000e+30 : f32
    %51 = vector.broadcast %cst_21 : f32 to vector<8x8xf32>
    %52 = arith.select %41, %50, %51 : vector<8x8xi1>, vector<8x8xf32>
    %cst_22 = arith.constant dense<0xFF800000> : vector<8xf32>
    %53 = vector.multi_reduction <maximumf>, %52, %cst_22 [1] : vector<8x8xf32> to vector<8xf32>
    %54 = vector.shape_cast %53 : vector<8xf32> to vector<8x1xf32>
    %55 = vector.broadcast %54 : vector<8x1xf32> to vector<8x8xf32>
    %56 = arith.subf %52, %55 : vector<8x8xf32>
    %57 = math.exp %56 : vector<8x8xf32>
    %cst_23 = arith.constant dense<0.000000e+00> : vector<8xf32>
    %58 = vector.multi_reduction <add>, %57, %cst_23 [1] : vector<8x8xf32> to vector<8xf32>
    %59 = vector.shape_cast %58 : vector<8xf32> to vector<8x1xf32>
    %60 = tpu.reciprocal %59 {approx = true} : vector<8x1xf32> -> vector<8x1xf32>
    %61 = vector.broadcast %60 : vector<8x1xf32> to vector<8x8xf32>
    %62 = arith.mulf %57, %61 : vector<8x8xf32>
    %63 = arith.truncf %62 : vector<8x8xf32> to vector<8x8xbf16>
    %cst_24 = arith.constant dense<0.000000e+00> : vector<8x16xf32>
    %64 = tpu.matmul %63, %47, %cst_24 {dimension_numbers = #tpu.dot_dimension_numbers<[1], [0], [0], [1], [0, 0, 1, 1], [], []>} : vector<8x8xbf16>, vector<8x16xbf16>, vector<8x16xf32> -> vector<8x16xf32>
    %65 = vector.extract_strided_slice %36 {offsets = [0, 16], sizes = [8, 16], strides = [1, 1]} : vector<16x32xf32> to vector<8x16xf32>
    %66 = arith.truncf %65 : vector<8x16xf32> to vector<8x16xbf16>
    %67 = vector.extract_strided_slice %37 {offsets = [0, 16], sizes = [8, 16], strides = [1, 1]} : vector<16x32xf32> to vector<8x16xf32>
    %68 = arith.truncf %67 : vector<8x16xf32> to vector<8x16xbf16>
    %69 = vector.extract_strided_slice %38 {offsets = [0, 16], sizes = [8, 16], strides = [1, 1]} : vector<16x32xf32> to vector<8x16xf32>
    %70 = arith.truncf %69 : vector<8x16xf32> to vector<8x16xbf16>
    %cst_25 = arith.constant dense<0.000000e+00> : vector<8x8xf32>
    %71 = tpu.matmul %66, %68, %cst_25 {dimension_numbers = #tpu.dot_dimension_numbers<[1], [1], [0], [0], [0, 0, 1, 0], [], []>} : vector<8x16xbf16>, vector<8x16xbf16>, vector<8x8xf32> -> vector<8x8xf32>
    %cst_26 = arith.constant 2.500000e-01 : f32
    %72 = vector.broadcast %cst_26 : f32 to vector<8x8xf32>
    %73 = arith.mulf %71, %72 : vector<8x8xf32>
    %cst_27 = arith.constant -1.000000e+30 : f32
    %74 = vector.broadcast %cst_27 : f32 to vector<8x8xf32>
    %75 = arith.select %41, %73, %74 : vector<8x8xi1>, vector<8x8xf32>
    %cst_28 = arith.constant dense<0xFF800000> : vector<8xf32>
    %76 = vector.multi_reduction <maximumf>, %75, %cst_28 [1] : vector<8x8xf32> to vector<8xf32>
    %77 = vector.shape_cast %76 : vector<8xf32> to vector<8x1xf32>
    %78 = vector.broadcast %77 : vector<8x1xf32> to vector<8x8xf32>
    %79 = arith.subf %75, %78 : vector<8x8xf32>
    %80 = math.exp %79 : vector<8x8xf32>
    %cst_29 = arith.constant dense<0.000000e+00> : vector<8xf32>
    %81 = vector.multi_reduction <add>, %80, %cst_29 [1] : vector<8x8xf32> to vector<8xf32>
    %82 = vector.shape_cast %81 : vector<8xf32> to vector<8x1xf32>
    %83 = tpu.reciprocal %82 {approx = true} : vector<8x1xf32> -> vector<8x1xf32>
    %84 = vector.broadcast %83 : vector<8x1xf32> to vector<8x8xf32>
    %85 = arith.mulf %80, %84 : vector<8x8xf32>
    %86 = arith.truncf %85 : vector<8x8xf32> to vector<8x8xbf16>
    %cst_30 = arith.constant dense<0.000000e+00> : vector<8x16xf32>
    %87 = tpu.matmul %86, %70, %cst_30 {dimension_numbers = #tpu.dot_dimension_numbers<[1], [0], [0], [1], [0, 0, 1, 1], [], []>} : vector<8x8xbf16>, vector<8x16xbf16>, vector<8x16xf32> -> vector<8x16xf32>
    %88 = tpu.concatenate %64, %87 in 1 : vector<8x16xf32>, vector<8x16xf32> -> vector<8x32xf32>
    %89 = vector.extract_strided_slice %36 {offsets = [8, 0], sizes = [8, 16], strides = [1, 1]} : vector<16x32xf32> to vector<8x16xf32>
    %90 = arith.truncf %89 : vector<8x16xf32> to vector<8x16xbf16>
    %91 = vector.extract_strided_slice %37 {offsets = [8, 0], sizes = [8, 16], strides = [1, 1]} : vector<16x32xf32> to vector<8x16xf32>
    %92 = arith.truncf %91 : vector<8x16xf32> to vector<8x16xbf16>
    %93 = vector.extract_strided_slice %38 {offsets = [8, 0], sizes = [8, 16], strides = [1, 1]} : vector<16x32xf32> to vector<8x16xf32>
    %94 = arith.truncf %93 : vector<8x16xf32> to vector<8x16xbf16>
    %cst_31 = arith.constant dense<0.000000e+00> : vector<8x8xf32>
    %95 = tpu.matmul %90, %92, %cst_31 {dimension_numbers = #tpu.dot_dimension_numbers<[1], [1], [0], [0], [0, 0, 1, 0], [], []>} : vector<8x16xbf16>, vector<8x16xbf16>, vector<8x8xf32> -> vector<8x8xf32>
    %cst_32 = arith.constant 2.500000e-01 : f32
    %96 = vector.broadcast %cst_32 : f32 to vector<8x8xf32>
    %97 = arith.mulf %95, %96 : vector<8x8xf32>
    %cst_33 = arith.constant -1.000000e+30 : f32
    %98 = vector.broadcast %cst_33 : f32 to vector<8x8xf32>
    %99 = arith.select %41, %97, %98 : vector<8x8xi1>, vector<8x8xf32>
    %cst_34 = arith.constant dense<0xFF800000> : vector<8xf32>
    %100 = vector.multi_reduction <maximumf>, %99, %cst_34 [1] : vector<8x8xf32> to vector<8xf32>
    %101 = vector.shape_cast %100 : vector<8xf32> to vector<8x1xf32>
    %102 = vector.broadcast %101 : vector<8x1xf32> to vector<8x8xf32>
    %103 = arith.subf %99, %102 : vector<8x8xf32>
    %104 = math.exp %103 : vector<8x8xf32>
    %cst_35 = arith.constant dense<0.000000e+00> : vector<8xf32>
    %105 = vector.multi_reduction <add>, %104, %cst_35 [1] : vector<8x8xf32> to vector<8xf32>
    %106 = vector.shape_cast %105 : vector<8xf32> to vector<8x1xf32>
    %107 = tpu.reciprocal %106 {approx = true} : vector<8x1xf32> -> vector<8x1xf32>
    %108 = vector.broadcast %107 : vector<8x1xf32> to vector<8x8xf32>
    %109 = arith.mulf %104, %108 : vector<8x8xf32>
    %110 = arith.truncf %109 : vector<8x8xf32> to vector<8x8xbf16>
    %cst_36 = arith.constant dense<0.000000e+00> : vector<8x16xf32>
    %111 = tpu.matmul %110, %94, %cst_36 {dimension_numbers = #tpu.dot_dimension_numbers<[1], [0], [0], [1], [0, 0, 1, 1], [], []>} : vector<8x8xbf16>, vector<8x16xbf16>, vector<8x16xf32> -> vector<8x16xf32>
    %112 = vector.extract_strided_slice %36 {offsets = [8, 16], sizes = [8, 16], strides = [1, 1]} : vector<16x32xf32> to vector<8x16xf32>
    %113 = arith.truncf %112 : vector<8x16xf32> to vector<8x16xbf16>
    %114 = vector.extract_strided_slice %37 {offsets = [8, 16], sizes = [8, 16], strides = [1, 1]} : vector<16x32xf32> to vector<8x16xf32>
    %115 = arith.truncf %114 : vector<8x16xf32> to vector<8x16xbf16>
    %116 = vector.extract_strided_slice %38 {offsets = [8, 16], sizes = [8, 16], strides = [1, 1]} : vector<16x32xf32> to vector<8x16xf32>
    %117 = arith.truncf %116 : vector<8x16xf32> to vector<8x16xbf16>
    %cst_37 = arith.constant dense<0.000000e+00> : vector<8x8xf32>
    %118 = tpu.matmul %113, %115, %cst_37 {dimension_numbers = #tpu.dot_dimension_numbers<[1], [1], [0], [0], [0, 0, 1, 0], [], []>} : vector<8x16xbf16>, vector<8x16xbf16>, vector<8x8xf32> -> vector<8x8xf32>
    %cst_38 = arith.constant 2.500000e-01 : f32
    %119 = vector.broadcast %cst_38 : f32 to vector<8x8xf32>
    %120 = arith.mulf %118, %119 : vector<8x8xf32>
    %cst_39 = arith.constant -1.000000e+30 : f32
    %121 = vector.broadcast %cst_39 : f32 to vector<8x8xf32>
    %122 = arith.select %41, %120, %121 : vector<8x8xi1>, vector<8x8xf32>
    %cst_40 = arith.constant dense<0xFF800000> : vector<8xf32>
    %123 = vector.multi_reduction <maximumf>, %122, %cst_40 [1] : vector<8x8xf32> to vector<8xf32>
    %124 = vector.shape_cast %123 : vector<8xf32> to vector<8x1xf32>
    %125 = vector.broadcast %124 : vector<8x1xf32> to vector<8x8xf32>
    %126 = arith.subf %122, %125 : vector<8x8xf32>
    %127 = math.exp %126 : vector<8x8xf32>
    %cst_41 = arith.constant dense<0.000000e+00> : vector<8xf32>
    %128 = vector.multi_reduction <add>, %127, %cst_41 [1] : vector<8x8xf32> to vector<8xf32>
    %129 = vector.shape_cast %128 : vector<8xf32> to vector<8x1xf32>
    %130 = tpu.reciprocal %129 {approx = true} : vector<8x1xf32> -> vector<8x1xf32>
    %131 = vector.broadcast %130 : vector<8x1xf32> to vector<8x8xf32>
    %132 = arith.mulf %127, %131 : vector<8x8xf32>
    %133 = arith.truncf %132 : vector<8x8xf32> to vector<8x8xbf16>
    %cst_42 = arith.constant dense<0.000000e+00> : vector<8x16xf32>
    %134 = tpu.matmul %133, %117, %cst_42 {dimension_numbers = #tpu.dot_dimension_numbers<[1], [0], [0], [1], [0, 0, 1, 1], [], []>} : vector<8x8xbf16>, vector<8x16xbf16>, vector<8x16xf32> -> vector<8x16xf32>
    %135 = tpu.concatenate %111, %134 in 1 : vector<8x16xf32>, vector<8x16xf32> -> vector<8x32xf32>
    %136 = tpu.concatenate %88, %135 in 0 : vector<8x32xf32>, vector<8x32xf32> -> vector<16x32xf32>
    %137 = arith.truncf %136 : vector<16x32xf32> to vector<16x32xbf16>
    %c0_43 = arith.constant 0 : index
    %c0_44 = arith.constant 0 : index
    %c0_45 = arith.constant 0 : index
    %138 = vector.load %arg6[%c0_43, %c0_44, %c0_45] : memref<1x32x32xbf16, #tpu.memory_space<vmem>>, vector<1x32x32xbf16>
    %139 = vector.shape_cast %138 : vector<1x32x32xbf16> to vector<32x32xbf16>
    %cst_46 = arith.constant dense<0.000000e+00> : vector<16x32xf32>
    %140 = tpu.matmul %137, %139, %cst_46 {dimension_numbers = #tpu.dot_dimension_numbers<[1], [0], [0], [1], [0, 0, 1, 1], [], []>} : vector<16x32xbf16>, vector<32x32xbf16>, vector<16x32xf32> -> vector<16x32xf32>
    %c0_47 = arith.constant 0 : index
    %c0_48 = arith.constant 0 : index
    %c0_49 = arith.constant 0 : index
    %141 = vector.load %arg7[%c0_47, %c0_48, %c0_49] : memref<1x1x32xf32, #tpu.memory_space<vmem>>, vector<1x1x32xf32>
    %142 = vector.shape_cast %141 : vector<1x1x32xf32> to vector<1x32xf32>
    %143 = vector.broadcast %142 : vector<1x32xf32> to vector<16x32xf32>
    %144 = arith.addf %140, %143 : vector<16x32xf32>
    %145 = arith.addf %3, %144 : vector<16x32xf32>
    %c0_50 = arith.constant 0 : index
    %c0_51 = arith.constant 0 : index
    %c0_52 = arith.constant 0 : index
    %146 = vector.load %arg8[%c0_50, %c0_51, %c0_52] : memref<1x1x32xf32, #tpu.memory_space<vmem>>, vector<1x1x32xf32>
    %147 = vector.shape_cast %146 : vector<1x1x32xf32> to vector<1x32xf32>
    %c0_53 = arith.constant 0 : index
    %c0_54 = arith.constant 0 : index
    %c0_55 = arith.constant 0 : index
    %148 = vector.load %arg9[%c0_53, %c0_54, %c0_55] : memref<1x1x32xf32, #tpu.memory_space<vmem>>, vector<1x1x32xf32>
    %149 = vector.shape_cast %148 : vector<1x1x32xf32> to vector<1x32xf32>
    %cst_56 = arith.constant dense<0.000000e+00> : vector<16xf32>
    %150 = vector.multi_reduction <add>, %145, %cst_56 [1] : vector<16x32xf32> to vector<16xf32>
    %151 = vector.shape_cast %150 : vector<16xf32> to vector<16x1xf32>
    %cst_57 = arith.constant 3.200000e+01 : f32
    %152 = vector.broadcast %cst_57 : f32 to vector<16x1xf32>
    %153 = arith.divf %151, %152 : vector<16x1xf32>
    %154 = vector.broadcast %153 : vector<16x1xf32> to vector<16x32xf32>
    %155 = arith.subf %145, %154 : vector<16x32xf32>
    %156 = arith.mulf %155, %155 : vector<16x32xf32>
    %cst_58 = arith.constant dense<0.000000e+00> : vector<16xf32>
    %157 = vector.multi_reduction <add>, %156, %cst_58 [1] : vector<16x32xf32> to vector<16xf32>
    %158 = vector.shape_cast %157 : vector<16xf32> to vector<16x1xf32>
    %cst_59 = arith.constant 3.200000e+01 : f32
    %159 = vector.broadcast %cst_59 : f32 to vector<16x1xf32>
    %160 = arith.divf %158, %159 : vector<16x1xf32>
    %cst_60 = arith.constant 9.99999974E-6 : f32
    %161 = vector.broadcast %cst_60 : f32 to vector<16x1xf32>
    %162 = arith.addf %160, %161 : vector<16x1xf32>
    %163 = math.rsqrt %162 : vector<16x1xf32>
    %164 = vector.broadcast %163 : vector<16x1xf32> to vector<16x32xf32>
    %165 = arith.mulf %155, %164 : vector<16x32xf32>
    %166 = vector.broadcast %147 : vector<1x32xf32> to vector<16x32xf32>
    %167 = arith.mulf %165, %166 : vector<16x32xf32>
    %168 = vector.broadcast %149 : vector<1x32xf32> to vector<16x32xf32>
    %169 = arith.addf %167, %168 : vector<16x32xf32>
    %170 = arith.truncf %169 : vector<16x32xf32> to vector<16x32xbf16>
    %c0_61 = arith.constant 0 : index
    %c0_62 = arith.constant 0 : index
    %c0_63 = arith.constant 0 : index
    %171 = vector.load %arg10[%c0_61, %c0_62, %c0_63] : memref<1x32x128xbf16, #tpu.memory_space<vmem>>, vector<1x32x128xbf16>
    %172 = vector.shape_cast %171 : vector<1x32x128xbf16> to vector<32x128xbf16>
    %cst_64 = arith.constant dense<0.000000e+00> : vector<16x128xf32>
    %173 = tpu.matmul %170, %172, %cst_64 {dimension_numbers = #tpu.dot_dimension_numbers<[1], [0], [0], [1], [0, 0, 1, 1], [], []>} : vector<16x32xbf16>, vector<32x128xbf16>, vector<16x128xf32> -> vector<16x128xf32>
    %c0_65 = arith.constant 0 : index
    %c0_66 = arith.constant 0 : index
    %c0_67 = arith.constant 0 : index
    %174 = vector.load %arg11[%c0_65, %c0_66, %c0_67] : memref<1x1x128xf32, #tpu.memory_space<vmem>>, vector<1x1x128xf32>
    %175 = vector.shape_cast %174 : vector<1x1x128xf32> to vector<1x128xf32>
    %176 = vector.broadcast %175 : vector<1x128xf32> to vector<16x128xf32>
    %177 = arith.addf %173, %176 : vector<16x128xf32>
    %cst_68 = arith.constant 1.702000e+00 : f32
    %178 = vector.broadcast %cst_68 : f32 to vector<16x128xf32>
    %179 = arith.mulf %178, %177 : vector<16x128xf32>
    %180 = arith.negf %179 : vector<16x128xf32>
    %181 = math.exp %180 : vector<16x128xf32>
    %cst_69 = arith.constant 1.000000e+00 : f32
    %182 = vector.broadcast %cst_69 : f32 to vector<16x128xf32>
    %183 = arith.addf %182, %181 : vector<16x128xf32>
    %184 = arith.divf %182, %183 : vector<16x128xf32>
    %185 = arith.mulf %177, %184 : vector<16x128xf32>
    %186 = arith.truncf %185 : vector<16x128xf32> to vector<16x128xbf16>
    %c0_70 = arith.constant 0 : index
    %c0_71 = arith.constant 0 : index
    %c0_72 = arith.constant 0 : index
    %187 = vector.load %arg12[%c0_70, %c0_71, %c0_72] : memref<1x128x32xbf16, #tpu.memory_space<vmem>>, vector<1x128x32xbf16>
    %188 = vector.shape_cast %187 : vector<1x128x32xbf16> to vector<128x32xbf16>
    %cst_73 = arith.constant dense<0.000000e+00> : vector<16x32xf32>
    %189 = tpu.matmul %186, %188, %cst_73 {dimension_numbers = #tpu.dot_dimension_numbers<[1], [0], [0], [1], [0, 0, 1, 1], [], []>} : vector<16x128xbf16>, vector<128x32xbf16>, vector<16x32xf32> -> vector<16x32xf32>
    %c0_74 = arith.constant 0 : index
    %c0_75 = arith.constant 0 : index
    %c0_76 = arith.constant 0 : index
    %190 = vector.load %arg13[%c0_74, %c0_75, %c0_76] : memref<1x1x32xf32, #tpu.memory_space<vmem>>, vector<1x1x32xf32>
    %191 = vector.shape_cast %190 : vector<1x1x32xf32> to vector<1x32xf32>
    %192 = vector.broadcast %191 : vector<1x32xf32> to vector<16x32xf32>
    %193 = arith.addf %189, %192 : vector<16x32xf32>
    %194 = arith.addf %145, %193 : vector<16x32xf32>
    %c0_77 = arith.constant 0 : index
    %c0_78 = arith.constant 0 : index
    %195 = vector.load %arg19[%c0_77, %c0_78] : memref<16x32xf32, #tpu.memory_space<vmem>>, vector<16x32xf32>
    tpu.vector_store %arg19[%c0_77, %c0_78], %194 {strides = array<i32>} : memref<16x32xf32, #tpu.memory_space<vmem>>, vector<16x32xf32>,
    %c1_i32 = arith.constant 1 : i32
    %196 = arith.cmpi eq, %arg0, %c1_i32 : i32
    %197 = arith.extui %196 : i1 to i32
    %c0_i32_79 = arith.constant 0 : i32
    %198 = arith.cmpi ne, %197, %c0_i32_79 : i32
    scf.if %198 {
      %c0_80 = arith.constant 0 : index
      %c0_81 = arith.constant 0 : index
      %199 = vector.load %arg14[%c0_80, %c0_81] : memref<1x32xf32, #tpu.memory_space<vmem>>, vector<1x32xf32>
      %c0_82 = arith.constant 0 : index
      %c0_83 = arith.constant 0 : index
      %200 = vector.load %arg15[%c0_82, %c0_83] : memref<1x32xf32, #tpu.memory_space<vmem>>, vector<1x32xf32>
      %cst_84 = arith.constant dense<0.000000e+00> : vector<16xf32>
      %201 = vector.multi_reduction <add>, %194, %cst_84 [1] : vector<16x32xf32> to vector<16xf32>
      %202 = vector.shape_cast %201 : vector<16xf32> to vector<16x1xf32>
      %cst_85 = arith.constant 3.200000e+01 : f32
      %203 = vector.broadcast %cst_85 : f32 to vector<16x1xf32>
      %204 = arith.divf %202, %203 : vector<16x1xf32>
      %205 = vector.broadcast %204 : vector<16x1xf32> to vector<16x32xf32>
      %206 = arith.subf %194, %205 : vector<16x32xf32>
      %207 = arith.mulf %206, %206 : vector<16x32xf32>
      %cst_86 = arith.constant dense<0.000000e+00> : vector<16xf32>
      %208 = vector.multi_reduction <add>, %207, %cst_86 [1] : vector<16x32xf32> to vector<16xf32>
      %209 = vector.shape_cast %208 : vector<16xf32> to vector<16x1xf32>
      %cst_87 = arith.constant 3.200000e+01 : f32
      %210 = vector.broadcast %cst_87 : f32 to vector<16x1xf32>
      %211 = arith.divf %209, %210 : vector<16x1xf32>
      %cst_88 = arith.constant 9.99999974E-6 : f32
      %212 = vector.broadcast %cst_88 : f32 to vector<16x1xf32>
      %213 = arith.addf %211, %212 : vector<16x1xf32>
      %214 = math.rsqrt %213 : vector<16x1xf32>
      %215 = vector.broadcast %214 : vector<16x1xf32> to vector<16x32xf32>
      %216 = arith.mulf %206, %215 : vector<16x32xf32>
      %217 = vector.broadcast %199 : vector<1x32xf32> to vector<16x32xf32>
      %218 = arith.mulf %216, %217 : vector<16x32xf32>
      %219 = vector.broadcast %200 : vector<1x32xf32> to vector<16x32xf32>
      %220 = arith.addf %218, %219 : vector<16x32xf32>
      %c0_89 = arith.constant 0 : index
      %c0_90 = arith.constant 0 : index
      %221 = vector.load %arg16[%c0_89, %c0_90] : memref<2x16xf32, #tpu.memory_space<vmem>>, vector<2x16xf32>
      %cst_91 = arith.constant dense<0.000000e+00> : vector<2x32xf32>
      %222 = tpu.matmul %221, %220, %cst_91 {dimension_numbers = #tpu.dot_dimension_numbers<[1], [0], [0], [1], [0, 0, 1, 1], [], []>} : vector<2x16xf32>, vector<16x32xf32>, vector<2x32xf32> -> vector<2x32xf32>
      %223 = arith.truncf %222 : vector<2x32xf32> to vector<2x32xbf16>
      %c0_92 = arith.constant 0 : index
      %c0_93 = arith.constant 0 : index
      %224 = vector.load %arg17[%c0_92, %c0_93] : memref<32x32xbf16, #tpu.memory_space<vmem>>, vector<32x32xbf16>
      %cst_94 = arith.constant dense<0.000000e+00> : vector<2x32xf32>
      %225 = tpu.matmul %223, %224, %cst_94 {dimension_numbers = #tpu.dot_dimension_numbers<[1], [0], [0], [1], [0, 0, 1, 1], [], []>} : vector<2x32xbf16>, vector<32x32xbf16>, vector<2x32xf32> -> vector<2x32xf32>
      %c0_95 = arith.constant 0 : index
      %c0_96 = arith.constant 0 : index
      %226 = vector.load %arg18[%c0_95, %c0_96] : memref<2x32xf32, #tpu.memory_space<vmem>>, vector<2x32xf32>
      tpu.vector_store %arg18[%c0_95, %c0_96], %225 {strides = array<i32>} : memref<2x32xf32, #tpu.memory_space<vmem>>, vector<2x32xf32>,
    } else {
    }
    return
  }
  func.func @transform_0(%arg0: i32) -> (i32, i32) {
    %c0_i32 = arith.constant 0 : i32
    %c0_i32_0 = arith.constant 0 : i32
    %c0_i32_1 = arith.constant 0 : i32
    return %c0_i32, %c0_i32_0 : i32, i32
  }
  func.func @transform_1(%arg0: i32) -> (i32, i32, i32) {
    %c0_i32 = arith.constant 0 : i32
    %c0_i32_0 = arith.constant 0 : i32
    %c0_i32_1 = arith.constant 0 : i32
    return %arg0, %c0_i32, %c0_i32_0 : i32, i32, i32
  }
  func.func @transform_2(%arg0: i32) -> (i32, i32, i32) {
    %c0_i32 = arith.constant 0 : i32
    %c0_i32_0 = arith.constant 0 : i32
    %c0_i32_1 = arith.constant 0 : i32
    return %arg0, %c0_i32, %c0_i32_0 : i32, i32, i32
  }
  func.func @transform_3(%arg0: i32) -> (i32, i32, i32) {
    %c0_i32 = arith.constant 0 : i32
    %c0_i32_0 = arith.constant 0 : i32
    %c0_i32_1 = arith.constant 0 : i32
    return %arg0, %c0_i32, %c0_i32_0 : i32, i32, i32
  }
  func.func @transform_4(%arg0: i32) -> (i32, i32, i32) {
    %c0_i32 = arith.constant 0 : i32
    %c0_i32_0 = arith.constant 0 : i32
    %c0_i32_1 = arith.constant 0 : i32
    return %arg0, %c0_i32, %c0_i32_0 : i32, i32, i32
  }
  func.func @transform_5(%arg0: i32) -> (i32, i32, i32) {
    %c0_i32 = arith.constant 0 : i32
    %c0_i32_0 = arith.constant 0 : i32
    %c0_i32_1 = arith.constant 0 : i32
    return %arg0, %c0_i32, %c0_i32_0 : i32, i32, i32
  }
  func.func @transform_6(%arg0: i32) -> (i32, i32, i32) {
    %c0_i32 = arith.constant 0 : i32
    %c0_i32_0 = arith.constant 0 : i32
    %c0_i32_1 = arith.constant 0 : i32
    return %arg0, %c0_i32, %c0_i32_0 : i32, i32, i32
  }
  func.func @transform_7(%arg0: i32) -> (i32, i32, i32) {
    %c0_i32 = arith.constant 0 : i32
    %c0_i32_0 = arith.constant 0 : i32
    %c0_i32_1 = arith.constant 0 : i32
    return %arg0, %c0_i32, %c0_i32_0 : i32, i32, i32
  }
  func.func @transform_8(%arg0: i32) -> (i32, i32, i32) {
    %c0_i32 = arith.constant 0 : i32
    %c0_i32_0 = arith.constant 0 : i32
    %c0_i32_1 = arith.constant 0 : i32
    return %arg0, %c0_i32, %c0_i32_0 : i32, i32, i32
  }
  func.func @transform_9(%arg0: i32) -> (i32, i32, i32) {
    %c0_i32 = arith.constant 0 : i32
    %c0_i32_0 = arith.constant 0 : i32
    %c0_i32_1 = arith.constant 0 : i32
    return %arg0, %c0_i32, %c0_i32_0 : i32, i32, i32
  }
  func.func @transform_10(%arg0: i32) -> (i32, i32, i32) {
    %c0_i32 = arith.constant 0 : i32
    %c0_i32_0 = arith.constant 0 : i32
    %c0_i32_1 = arith.constant 0 : i32
    return %arg0, %c0_i32, %c0_i32_0 : i32, i32, i32
  }
  func.func @transform_11(%arg0: i32) -> (i32, i32, i32) {
    %c0_i32 = arith.constant 0 : i32
    %c0_i32_0 = arith.constant 0 : i32
    %c0_i32_1 = arith.constant 0 : i32
    return %arg0, %c0_i32, %c0_i32_0 : i32, i32, i32
  }
  func.func @transform_12(%arg0: i32) -> (i32, i32, i32) {
    %c0_i32 = arith.constant 0 : i32
    %c0_i32_0 = arith.constant 0 : i32
    %c0_i32_1 = arith.constant 0 : i32
    return %arg0, %c0_i32, %c0_i32_0 : i32, i32, i32
  }
  func.func @transform_13(%arg0: i32) -> (i32, i32) {
    %c0_i32 = arith.constant 0 : i32
    %c0_i32_0 = arith.constant 0 : i32
    %c0_i32_1 = arith.constant 0 : i32
    return %c0_i32, %c0_i32_0 : i32, i32
  }
  func.func @transform_14(%arg0: i32) -> (i32, i32) {
    %c0_i32 = arith.constant 0 : i32
    %c0_i32_0 = arith.constant 0 : i32
    %c0_i32_1 = arith.constant 0 : i32
    return %c0_i32, %c0_i32_0 : i32, i32
  }
  func.func @transform_15(%arg0: i32) -> (i32, i32) {
    %c0_i32 = arith.constant 0 : i32
    %c0_i32_0 = arith.constant 0 : i32
    %c0_i32_1 = arith.constant 0 : i32
    return %c0_i32, %c0_i32_0 : i32, i32
  }
  func.func @transform_16(%arg0: i32) -> (i32, i32) {
    %c0_i32 = arith.constant 0 : i32
    %c0_i32_0 = arith.constant 0 : i32
    %c0_i32_1 = arith.constant 0 : i32
    return %c0_i32, %c0_i32_0 : i32, i32
  }
  func.func @transform_17(%arg0: i32) -> (i32, i32) {
    %c0_i32 = arith.constant 0 : i32
    %c0_i32_0 = arith.constant 0 : i32
    %c0_i32_1 = arith.constant 0 : i32
    return %c0_i32, %c0_i32_0 : i32, i32
  }
}

</mosaic_0001>

<bundles_post_ra>
// kernel: class_encoder_forward.1
= control target key start
LH: loop header
LB: loop body
LE: loop exit
PB: predicated region body
PF: predicated region fallthrough
CT: control target
= control target key end

     0   :  { %s2690_s0 = inlined_call_operand.vmem [shape: f32[16,32], index: 0, kind: input, shape index: {}]   ;;  %s2691_s1 = inlined_call_operand.vmem [shape: f32[2,1,32], index: 1, kind: input, shape index: {}]   ;;  %s2692_s2 = inlined_call_operand.vmem [shape: f32[2,1,32], index: 2, kind: input, shape index: {}]   ;;  %s2693_s3 = inlined_call_operand.vmem [shape: bf16[2,32,96], index: 3, kind: input, shape index: {}]   ;;  %s2694_s4 = inlined_call_operand.vmem [shape: f32[2,1,96], index: 4, kind: input, shape index: {}]   ;;  %s2695_s5 = inlined_call_operand.vmem [shape: bf16[2,32,32], index: 5, kind: input, shape index: {}]   ;;  %s2696_s6 = inlined_call_operand.vmem [shape: f32[2,1,32], index: 6, kind: input, shape index: {}]   ;;  %s2697_s7 = inlined_call_operand.vmem [shape: f32[2,1,32], index: 7, kind: input, shape index: {}]   ;;  %s2698_s8 = inlined_call_operand.vmem [shape: f32[2,1,32], index: 8, kind: input, shape index: {}]   ;;  %s2699_s9 = inlined_call_operand.vmem [shape: bf16[2,32,128], index: 9, kind: input, shape index: {}]   ;;  %s2700_s10 = inlined_call_operand.vmem [shape: f32[2,1,128], index: 10, kind: input, shape index: {}]   ;;  %s2701_s11 = inlined_call_operand.vmem [shape: bf16[2,128,32], index: 11, kind: input, shape index: {}]   ;;  %s2702_s12 = inlined_call_operand.vmem [shape: f32[2,1,32], index: 12, kind: input, shape index: {}]   ;;  %s2703_s13 = inlined_call_operand.vmem [shape: f32[1,32], index: 13, kind: input, shape index: {}]   ;;  %s2704_s14 = inlined_call_operand.vmem [shape: f32[1,32], index: 14, kind: input, shape index: {}]   ;;  %s2705_s15 = inlined_call_operand.vmem [shape: f32[2,16], index: 15, kind: input, shape index: {}]   ;;  %s2706_s16 = inlined_call_operand.vmem [shape: bf16[32,32], index: 16, kind: input, shape index: {}]   ;;  %s2707_s17 = inlined_call_operand.hbm [shape: f32[2,32], index: 17, kind: output, shape index: {}]  }
   0x1   :  { %2711 = sst [smem:[#allocation7_spill]] %s2690_s0 }
   0x2   :  { %2712 = sst [smem:[#allocation8_spill]] %s2691_s1 }
   0x3   :  { %2713 = sst [smem:[#allocation9_spill]] %s2693_s3 }
   0x4   :  { %2714 = sst [smem:[#allocation10_spill]] %s2695_s5 }
   0x5   :  { %2715 = sst [smem:[#allocation11_spill]] %s2703_s13 }
   0x6   :  { %2716 = sst [smem:[#allocation12_spill]] %s2704_s14 }
   0x7   :  { %2717 = sst [smem:[#allocation13_spill]] %s2705_s15 }
   0x8   :  { %2718 = sst [smem:[#allocation14_spill]] %s2707_s17 }
   0x9   :  { %22 = vsyncpa [#allocation4], 0  ;;  %s2388_s24 = smov 0  }
   0xa LB: > { %2719 = sst [smem:[#allocation6_spill]] %s2284_s24  ;;  %s2394_s25 = sadd.s32 4294967295, %s2284_s24   ;;  %s2284_s24 = sphi %s2388_s24, %s28_s24  }
   0xb   : > { %p1955_p0 = scmp.ge.s32.totalorder %s2284_s24, 1  ;;  %p577_p1 = scmp.lt.s32.totalorder %s2284_s24, 3 }
   0xd   : > { %p578_p2 = pnand %p1955_p0, %p577_p1 }
   0xe   : > { %p663_p3 = scmp.lt.s32.totalorder (!%p578_p2), %s2394_s25, 1  ;;  %s2721_s3 = sld [smem:[#allocation9_spill]] (!%p578_p2) }
   0xf   : > { %581 = sbr.rel (%p578_p2) target bundleno = 3399 (0xd47), region = 88  ;;  %s2722_s5 = sld [smem:[#allocation10_spill]] (!%p578_p2) }
  0x10   : > { %p1964_p4 = scmp.ne.s32.totalorder (!%p578_p2), %s2394_s25, 0 }
  0x16   : > { %s2400_s26 = scalar_select %p663_p3, %s2394_s25, 1 }
  0x17   : > { %711 = sbr.rel (%p1964_p4) target bundleno = 31 (0x1f), region = 92  ;;  %s2723_s23 = sld [smem:[#allocation7_spill]] (!%p1964_p4)  ;;  %vm714_vm0 = vcmask (!%p1964_p4), 261120  }
  0x18   : > { %s2011_s1 = sshll.u32 %s2400_s26, 4  ;;  %s687_s14 = scalar_lea.vmem %s2697_s7, %s2400_s26 }
  0x19   : > { %s2418_s28 = scalar_lea.vmem %s2721_s3, %s2011_s1  ;;  %s2423_s15 = scalar_lea.vmem %s2722_s5, %s2011_s1 }
  0x1a   : > { %s690_s22 = scalar_lea.vmem %s2698_s8, %s2400_s26  ;;  %s2440_s3 = scalar_lea.vmem %s2699_s9, %s2011_s1 }
  0x1b   : > { %s698_s5 = scalar_lea.vmem %s2700_s10, %s2400_s26  ;;  %s2014_s13 = sshll.u32 %s2400_s26, 6 }
  0x1c   : > { %s2450_s30 = scalar_lea.vmem %s2701_s11, %s2014_s13  ;;  %s706_s20 = scalar_lea.vmem %s2702_s12, %s2400_s26 }
  0x1d   : > { %v712_v0 = vld [vmem:[%s2723_s23] sm:$0xff] (!%p1964_p4)  ;;  %v713_v1 = vld [vmem:[%s2723_s23 + $0x8] sm:$0xff] (!%p1964_p4) }
  0x1e   : > { %715 = vst.msk [vmem:[#allocation2] sm:$0xff] %vm714_vm0, %v712_v0  ;;  %716 = vst.msk [vmem:[#allocation2 + $0x8] sm:$0xff] %vm714_vm0, %v713_v1 }
  0x1f PF: > { %vm721_vm1 = vcmask 261120   ;;  %v2196_v16 = vld [vmem:[%s2418_s28] sm:$0xff]   ;;  %v2286_v17 = vmov 0.0   ;;  %v2197_v18 = vld [vmem:[%s2418_s28 + $0x8] sm:$0xff]   ;;  %vm2287_vm2 = vmmov 0   ;;  %s2724_s24 = sld [smem:[#allocation8_spill]]  ;;  %s2726_s18 = scalar_lea.vmem %s2692_s2, %s2400_s26  ;;  %v833_v55 = vlaneseq }
  0x20   : > { %2055 = vmatprep.subr.bf16.mxu0 %v2286_v17  ;;  %2075 = vmatprep.subr.bf16.mxu1 %v2286_v17  ;;  %v1966_v31 = vld [vmem:[%s2726_s18] ss:$0 sm:$0xff]  ;;  %s2727_s27 = scalar_lea.vmem %s2694_s4, %s2400_s26  ;;  %s2288_s17 = smov 80   ;;  %vm842_vm3 = vcmask 130048   ;;  %vm891_vm5 = vcmask 64512   ;;  %vm909_vm6 = vcmask 1043456  }
  0x21   : > { %2056 = vmatpush3.bf16.msra.mxu0 %v2196_v16  ;;  %2059 = vmatprep.mubr.msk.bf16.mxu0 %vm2287_vm2, %v2286_v17  ;;  %v1967_v36 = vld [vmem:[%s2727_s27] ss:$0 sm:$0xff]  ;;  %s2289_s13 = smov 96   ;;  %s2290_s28 = smov 112   ;;  %v834_v56 = vshrl.u32 %v833_v55, 7  ;;  %v836_v57 = vand.u32 127, %v833_v55 }
  0x22   : > { %2057 = vmatprep.subr.bf16.mxu0 %v2286_v17  ;;  %2077 = vmatprep.mubr.msk.bf16.mxu1 %vm2287_vm2, %v2286_v17  ;;  %s2293_s29 = smov 16   ;;  %s2728_s18 = scalar_lea.vmem %s2696_s6, %s2400_s26 }
  0x23   : > { %vm837_vm4 = vcmp.le.s32.totalorder %v836_v57, %v834_v56  ;;  %p2000_p5 = scmp.ne.s32.totalorder %s2394_s25, 1 }
  0x24   : > { %vm2295_vm7 = vmmov (!%p2000_p5), 0   ;;  %vm1796_vm8 = vcmask (!%p2000_p5), 254976  }
  0x25   : > { %v2463_v2 = vld [vmem:[#allocation2] sm:$0xff]  ;;  %v2465_v3 = vld [vmem:[#allocation2 + $0x8] sm:$0xff]  ;;  %2058 = vmatpush3.bf16.msra.mxu0 %v2197_v18  ;;  %s2725_s0 = scalar_lea.vmem %s2724_s24, %s2400_s26  ;;  %s2291_s24 = smov 48  }
  0x26   : > { %v722_v4 = vsel %vm721_vm1, %v2463_v2, 0.0  ;;  %v725_v5 = vsel %vm721_vm1, %v2465_v3, 0.0  ;;  %2063 = vmatprep.subr.bf16.mxu0 %v2286_v17  ;;  %v1965_v27 = vld [vmem:[%s2725_s0] ss:$0 sm:$0xff]  ;;  %s2292_s0 = smov 64  }
  0x27   : > { %723 = vadd.xlane.f32.xlu0 %v722_v4 }
  0x2b   : > { %726 = vadd.xlane.f32.xlu0 %v725_v5 }
  0xb4   : > { %v724_v6 = vpop.xlane.xlu0 %723 }
  0xb5   : > { %v729_v7 = vmul.f32 0.03125, %v724_v6 }
  0xb7   : > { %v731_v8 = vsub.f32 %v2463_v2, %v729_v7 }
  0xb8   : > { %v727_v9 = vpop.xlane.xlu0 %726 }
  0xb9   : > { %v730_v10 = vmul.f32 0.03125, %v727_v9  ;;  %v733_v11 = vmul.f32 %v731_v8, %v731_v8 }
  0xbb   : > { %v732_v12 = vsub.f32 %v2465_v3, %v730_v10  ;;  %v735_v13 = vsel %vm721_vm1, %v733_v11, 0.0 }
  0xbc   : > { %736 = vadd.xlane.f32.xlu1 %v735_v13 }
  0xbd   : > { %v734_v14 = vmul.f32 %v732_v12, %v732_v12 }
  0xbf   : > { %v738_v15 = vsel %vm721_vm1, %v734_v14, 0.0 }
  0xc0   : > { %739 = vadd.xlane.f32.xlu1 %v738_v15 }
 0x149   : > { %v737_v19 = vpop.xlane.xlu1 %736 }
 0x14a   : > { %v741_v20 = vmul.f32 0.03125, %v737_v19 }
 0x14c   : > { %v743_v21 = vadd.f32 1e-05, %v741_v20 }
 0x14d   : > { %v740_v22 = vpop.xlane.xlu1 %739 }
 0x14e   : > { %2210 = vrsqrt.f32 %v743_v21  ;;  %v742_v23 = vmul.f32 0.03125, %v740_v22 }
 0x150   : > { %v744_v24 = vadd.f32 1e-05, %v742_v23 }
 0x152   : > { %2212 = vrsqrt.f32 %v744_v24 }
 0x158   : > { %v2211_v25 = vpop.eup %2210 }
 0x159   : > { %v747_v26 = vmul.f32 %v2211_v25, %v731_v8 }
 0x15b   : > { %v755_v30 = vmul.f32 %v1965_v27, %v747_v26 }
 0x15c   : > { %v2213_v28 = vpop.eup %2212 }
 0x15d   : > { %v748_v29 = vmul.f32 %v2213_v28, %v732_v12  ;;  %v763_v33 = vadd.f32 %v1966_v31, %v755_v30 }
 0x15f   : > { %v756_v32 = vmul.f32 %v1965_v27, %v748_v29 }
 0x161   : > { %v764_v34 = vadd.f32 %v1966_v31, %v756_v32 }
 0x163   : > { %v765_v35 = vpack.c.bf16 %v764_v34, %v763_v33 }
 0x165   : > { %2060 = vmatmul.mubr.msk.bf16.vlgmr.msra.gmra.mrb[0].mxu0 %vm721_vm1, %v765_v35 }
 0x166   : > { %2065 = vmatprep.mubr.msk.bf16.mxu0 %vm2287_vm2, %v2286_v17 }
 0x238   : > { %v826_v37 = vpop.f32.mrb[0].mxu0 }
 0x239   : > { %v827_v38 = vadd.f32 %v1967_v36, %v826_v37  ;;  %v2061_v39 = vpop.f32.mrb[1].mxu0 }
 0x23a   : > { %v829_v40 = vpop.f32.mrb[2].mxu0 }
 0x23b   : > { %v2503_v41 = vpack.c.bf16 %v827_v38, %v827_v38  ;;  %v830_v42 = vadd.f32 %v1967_v36, %v829_v40  ;;  %v2062_v43 = vpop.f32.mrb[3].mxu0 }
 0x23d   : > { %955 = vrot.lane.b32.xlu1 %v2503_v41, %s2288_s17  ;;  %840 = vrot.lane.b32.xlu0 %v2503_v41, %s2289_s13  ;;  %v2507_v44 = vpack.c.bf16 %v830_v42, %v830_v42 }
 0x241   : > { %953 = vrot.lane.b32.xlu1 %v2503_v41, %s2290_s28  ;;  %1184 = vrot.lane.b32.xlu0 %v2507_v44, %s2288_s17 }
 0x245   : > { %1072 = vrot.lane.b32.xlu1 %v2507_v44, %s2289_s13 }
 0x249   : > { %1182 = vrot.lane.b32.xlu1 %v2507_v44, %s2290_s28  ;;  %s2729_s28 = sld [smem:[#allocation11_spill]] (!%p2000_p5) }
 0x2af   : > { %v956_v45 = vpop.permute.xlu1 %955  ;;  %v841_v46 = vpop.permute.xlu0 %840 }
 0x2b0   : > { %v847_v47 = vsel %vm842_vm3, %v841_v46, 0  ;;  %v961_v48 = vsel %vm842_vm3, %v956_v45, 0 }
 0x2b1   : > { %2064 = vmatpush3.bf16.xpose.msra.mxu0 %v847_v47  ;;  %2076 = vmatpush3.bf16.xpose.msra.mxu1 %v961_v48 }
 0x2b2   : > { %2087 = vmatprep.subr.bf16.mxu1 %v2286_v17  ;;  %2069 = vmatprep.subr.bf16.mxu0 %v2286_v17 }
 0x2b3   : > { %v954_v49 = vpop.permute.xlu1 %953  ;;  %v1185_v52 = vpop.permute.xlu0 %1184 }
 0x2b4   : > { %v1190_v53 = vsel %vm842_vm3, %v1185_v52, 0 }
 0x2b7   : > { %v1073_v50 = vpop.permute.xlu1 %1072 }
 0x2b8   : > { %v1078_v51 = vsel %vm842_vm3, %v1073_v50, 0  ;;  %2066 = vmatmul.mubr.msk.bf16.vlgmr.msra.gmra.mrb[4].mxu0 %vm842_vm3, %v2503_v41  ;;  %2078 = vmatmul.mubr.msk.bf16.vlgmr.msra.gmra.mrb[0].mxu1 %vm842_vm3, %v954_v49 }
 0x2b9   : > { %2088 = vmatpush3.bf16.xpose.msra.mxu1 %v1078_v51  ;;  %2089 = vmatprep.mubr.msk.bf16.mxu1 %vm2287_vm2, %v2286_v17 }
 0x2ba   : > { %2099 = vmatprep.subr.bf16.mxu1 %v2286_v17  ;;  %2071 = vmatprep.mubr.msk.bf16.mxu0 %vm2287_vm2, %v2286_v17 }
 0x2bb   : > { %v1183_v54 = vpop.permute.xlu1 %1182 }
 0x2c0   : > { %2090 = vmatmul.mubr.msk.bf16.vlgmr.msra.gmra.mrb[4].mxu1 %vm842_vm3, %v2507_v44 }
 0x2c1   : > { %2100 = vmatpush3.bf16.xpose.msra.mxu1 %v1190_v53  ;;  %2101 = vmatprep.mubr.msk.bf16.mxu1 %vm2287_vm2, %v2286_v17 }
 0x2c2   : > { %2111 = vmatprep.subr.bf16.mxu1 %v2286_v17 }
 0x2c8   : > { %2102 = vmatmul.mubr.msk.bf16.vlgmr.msra.gmra.mrb[8].mxu1 %vm842_vm3, %v1183_v54 }
 0x2c9   : > { %2115 = vmatprep.mubr.msk.bf16.mxu1 %vm2287_vm2, %v2286_v17 }
 0x38b   : > { %v883_v58 = vpop.f32.mrb[4].mxu0  ;;  %v997_v59 = vpop.f32.mrb[0].mxu1 }
 0x38c   : > { %v889_v60 = vmul.f32 0.25, %v883_v58  ;;  %v1003_v61 = vmul.f32 0.25, %v997_v59  ;;  %v2067_v62 = vpop.f32.mrb[5].mxu0  ;;  %v2079_v63 = vpop.f32.mrb[1].mxu1 }
 0x38d   : > { %v886_v0 = vpop.f32.mrb[6].mxu0  ;;  %v1000_v1 = vpop.f32.mrb[2].mxu1 }
 0x38e   : > { %v2068_v4 = vpop.f32.mrb[7].mxu0  ;;  %v2080_v5 = vpop.f32.mrb[3].mxu1  ;;  %v1004_v6 = vsel %vm837_vm4, %v1003_v61, -1e+30  ;;  %v890_v7 = vsel %vm837_vm4, %v889_v60, -1e+30 }
 0x38f   : > { %v1005_v8 = vsel %vm891_vm5, %v1004_v6, -inf  ;;  %v892_v9 = vsel %vm891_vm5, %v890_v7, -inf }
 0x390   : > { %1006 = vmax.xlane.f32.xlu1 %v1005_v8  ;;  %893 = vmax.xlane.f32.xlu0 %v892_v9 }
 0x393   : > { %v1114_v10 = vpop.f32.mrb[4].mxu1 }
 0x394   : > { %v1120_v11 = vmul.f32 0.25, %v1114_v10  ;;  %v2091_v12 = vpop.f32.mrb[5].mxu1 }
 0x395   : > { %v1117_v13 = vpop.f32.mrb[6].mxu1 }
 0x396   : > { %v2092_v14 = vpop.f32.mrb[7].mxu1  ;;  %v1121_v15 = vsel %vm837_vm4, %v1120_v11, -1e+30 }
 0x397   : > { %v1122_v16 = vsel %vm891_vm5, %v1121_v15, -inf }
 0x398   : > { %1123 = vmax.xlane.f32.xlu0 %v1122_v16 }
 0x39b   : > { %v1226_v18 = vpop.f32.mrb[8].mxu1 }
 0x39c   : > { %v1232_v19 = vmul.f32 0.25, %v1226_v18  ;;  %v2103_v20 = vpop.f32.mrb[9].mxu1 }
 0x39d   : > { %v1229_v21 = vpop.f32.mrb[10].mxu1 }
 0x39e   : > { %v2104_v22 = vpop.f32.mrb[11].mxu1  ;;  %v1233_v23 = vsel %vm837_vm4, %v1232_v19, -1e+30  ;;  %v2199_v21 = vld [vmem:[%s2423_s15 + $0x8] sm:$0xff]  }
 0x39f   : > { %v1234_v24 = vsel %vm891_vm5, %v1233_v23, -inf }
 0x3a0   : > { %1235 = vmax.xlane.f32.xlu0 %v1234_v24 }
 0x41d   : > { %v1007_v25 = vpop.xlane.xlu1 %1006  ;;  %v894_v26 = vpop.xlane.xlu0 %893 }
 0x41e   : > { %v1008_v27 = vsub.f32 %v1004_v6, %v1007_v25  ;;  %v895_v28 = vsub.f32 %v890_v7, %v894_v26  ;;  %v2198_v7 = vld [vmem:[%s2423_s15] sm:$0xff]  }
 0x41f   : > { %2112 = vmatpush3.bf16.msra.mxu1 %v2198_v7 }
 0x420   : > { %v1009_v29 = vmul.f32 1.442695, %v1008_v27  ;;  %v896_v30 = vmul.f32 1.442695, %v895_v28  ;;  %2113 = vmatprep.subr.bf16.mxu1 %v2286_v17 }
 0x422   : > { %2214 = vpow2.f32 %v1009_v29 }
 0x423   : > { %2216 = vpow2.f32 %v896_v30  ;;  %2114 = vmatpush3.bf16.msra.mxu1 %v2199_v21 }
 0x424   : > { %2127 = vmatprep.subr.bf16.mxu1 %v2286_v17 }
 0x425   : > { %v1124_v31 = vpop.xlane.xlu0 %1123 }
 0x426   : > { %v1125_v32 = vsub.f32 %v1121_v15, %v1124_v31 }
 0x428   : > { %v1126_v33 = vmul.f32 1.442695, %v1125_v32 }
 0x42a   : > { %2218 = vpow2.f32 %v1126_v33  ;;  %v1979_v33 = vld [vmem:[%s2728_s18] ss:$0 sm:$0xff]  ;;  %s2731_s18 = sld [smem:[#allocation13_spill]] (!%p2000_p5) }
 0x42c   : > { %v2215_v34 = vpop.eup %2214 }
 0x42d   : > { %v2217_v35 = vpop.eup %2216  ;;  %v1011_v36 = vsel %vm891_vm5, %v2215_v34, 0.0  ;;  %v1236_v40 = vpop.xlane.xlu0 %1235 }
 0x42e   : > { %1012 = vadd.xlane.f32.xlu1 %v1011_v36  ;;  %v898_v37 = vsel %vm891_vm5, %v2217_v35, 0.0  ;;  %v1237_v42 = vsub.f32 %v1233_v23, %v1236_v40 }
 0x42f   : > { %899 = vadd.xlane.f32.xlu0 %v898_v37 }
 0x430   : > { %v1238_v43 = vmul.f32 1.442695, %v1237_v42 }
 0x432   : > { %2220 = vpow2.f32 %v1238_v43 }
 0x434   : > { %v2219_v38 = vpop.eup %2218 }
 0x435   : > { %v1128_v39 = vsel %vm891_vm5, %v2219_v38, 0.0 }
 0x436   : > { %1129 = vadd.xlane.f32.xlu0 %v1128_v39 }
 0x43c   : > { %v2221_v45 = vpop.eup %2220 }
 0x43d   : > { %v1240_v46 = vsel %vm891_vm5, %v2221_v45, 0.0 }
 0x43f   : > { %1017 = vrot.lane.b32.xlu1 %v2503_v41, %s2291_s24 }
 0x443   : > { %1134 = vrot.lane.b32.xlu1 %v2507_v44, %s2292_s0 }
 0x44c   : > { %904 = vrot.lane.b32.xlu0 %v2503_v41, %s2292_s0 }
 0x467   : > { %1241 = vadd.xlane.f32.xlu1 %v1240_v46 }
 0x478   : > { %1246 = vrot.lane.b32.xlu1 %v2507_v44, %s2291_s24 }
 0x4bb   : > { %v1013_v48 = vpop.xlane.xlu1 %1012 }
 0x4bc   : > { %v900_v47 = vpop.xlane.xlu0 %899 }
 0x4bd   : > { %2222 = vrcp.f32 %v900_v47 }
 0x4be   : > { %2224 = vrcp.f32 %v1013_v48 }
 0x4bf   : > { %v1018_v53 = vpop.permute.xlu1 %1017 }
 0x4c0   : > { %v1023_v44 = vsel %vm909_vm6, %v1018_v53, 0  ;;  %v2200_v53 = vld [vmem:[%s2440_s3] sm:$0xff]  }
 0x4c3   : > { %v1130_v49 = vpop.xlane.xlu0 %1129  ;;  %v1135_v57 = vpop.permute.xlu1 %1134 }
 0x4c4   : > { %2226 = vrcp.f32 %v1130_v49  ;;  %v1140_v60 = vsel %vm909_vm6, %v1135_v57, 0 }
 0x4c7   : > { %v2223_v50 = vpop.eup %2222  ;;  %v905_v51 = vpop.permute.xlu0 %904 }
 0x4c8   : > { %v902_v52 = vmul.f32 %v2223_v50, %v2217_v35  ;;  %v911_v41 = vsel %vm909_vm6, %v905_v51, 0  ;;  %v2225_v55 = vpop.eup %2224 }
 0x4c9   : > { %2070 = vmatpush3.bf16.msra.mxu0 %v911_v41  ;;  %v1015_v56 = vmul.f32 %v2225_v55, %v2215_v34 }
 0x4ca   : > { %v903_v54 = vpack.c.bf16 %v902_v52, %v902_v52  ;;  %2081 = vmatprep.subr.bf16.mxu0 %v2286_v17 }
 0x4cb   : > { %v1016_v58 = vpack.c.bf16 %v1015_v56, %v1015_v56 }
 0x4cc   : > { %2072 = vmatmul.mubr.msk.bf16.vlgmr.msra.gmra.mrb[8].mxu0 %vm891_vm5, %v903_v54  ;;  %v2201_v54 = vld [vmem:[%s2440_s3 + $0x8] sm:$0xff]  }
 0x4cd   : > { %2082 = vmatpush3.bf16.msra.mxu0 %v1023_v44  ;;  %2083 = vmatprep.mubr.msk.bf16.mxu0 %vm2287_vm2, %v2286_v17 }
 0x4ce   : > { %2093 = vmatprep.subr.bf16.mxu0 %v2286_v17  ;;  %v2227_v59 = vpop.eup %2226 }
 0x4cf   : > { %v1132_v61 = vmul.f32 %v2227_v59, %v2219_v38 }
 0x4d1   : > { %v1133_v62 = vpack.c.bf16 %v1132_v61, %v1132_v61 }
 0x4d4   : > { %2084 = vmatmul.mubr.msk.bf16.vlgmr.msra.gmra.mrb[12].mxu0 %vm891_vm5, %v1016_v58 }
 0x4d5   : > { %2094 = vmatpush3.bf16.msra.mxu0 %v1140_v60  ;;  %2095 = vmatprep.mubr.msk.bf16.mxu0 %vm2287_vm2, %v2286_v17 }
 0x4d6   : > { %2105 = vmatprep.subr.bf16.mxu0 %v2286_v17 }
 0x4dc   : > { %2096 = vmatmul.mubr.msk.bf16.vlgmr.msra.gmra.mrb[16].mxu0 %vm891_vm5, %v1133_v62  ;;  %v1983_v62 = vld [vmem:[%s687_s14] ss:$0 sm:$0xff] }
 0x4dd   : > { %2107 = vmatprep.mubr.msk.bf16.mxu0 %vm2287_vm2, %v2286_v17 }
 0x4f4   : > { %v1242_v63 = vpop.xlane.xlu1 %1241 }
 0x4f5   : > { %2228 = vrcp.f32 %v1242_v63 }
 0x4f8   : > { %v1247_v0 = vpop.permute.xlu1 %1246 }
 0x4f9   : > { %v1252_v1 = vsel %vm909_vm6, %v1247_v0, 0 }
 0x4fa   : > { %2106 = vmatpush3.bf16.msra.mxu0 %v1252_v1 }
 0x4fb   : > { %2119 = vmatprep.subr.bf16.mxu0 %v2286_v17 }
 0x4ff   : > { %v2229_v4 = vpop.eup %2228 }
 0x500   : > { %v1244_v5 = vmul.f32 %v2229_v4, %v2221_v45  ;;  %v1984_v4 = vld [vmem:[%s690_s22] ss:$0 sm:$0xff] }
 0x502   : > { %v1245_v6 = vpack.c.bf16 %v1244_v5, %v1244_v5 }
 0x504   : > { %2108 = vmatmul.mubr.msk.bf16.vlgmr.msra.gmra.mrb[20].mxu0 %vm891_vm5, %v1245_v6 }
 0x505   : > { %2123 = vmatprep.mubr.msk.bf16.mxu0 %vm2287_vm2, %v2286_v17  ;;  %2120 = vmatpush3.bf16.msra.mxu0 %v2200_v53 }
 0x506   : > { %2121 = vmatprep.subr.bf16.mxu0 %v2286_v17 }
 0x509   : > { %2122 = vmatpush3.bf16.msra.mxu0 %v2201_v54 }
 0x59f   : > { %v947_v8 = vpop.f32.mrb[8].mxu0 }
 0x5a0   : > { %v2073_v9 = vpop.f32.mrb[9].mxu0 }
 0x5a1   : > { %v950_v10 = vpop.f32.mrb[10].mxu0  ;;  %v2202_v9 = vld [vmem:[%s2450_s30] sm:$0xff]  }
 0x5a2   : > { %v2074_v11 = vpop.f32.mrb[11].mxu0  ;;  %v2203_v10 = vld [vmem:[%s2450_s30 + $0x8] sm:$0xff]  }
 0x5a3   : > { %v2204_v11 = vld [vmem:[%s2450_s30 + $0x10] sm:$0xff]  }
 0x5a7   : > { %v1059_v12 = vpop.f32.mrb[12].mxu0 }
 0x5a8   : > { %v2085_v13 = vpop.f32.mrb[13].mxu0 }
 0x5a9   : > { %v1062_v14 = vpop.f32.mrb[14].mxu0  ;;  %v2206_v13 = vld [vmem:[%s2450_s30 + $0x20] sm:$0xff]  }
 0x5aa   : > { %v2086_v15 = vpop.f32.mrb[15].mxu0  ;;  %v2207_v14 = vld [vmem:[%s2450_s30 + $0x28] sm:$0xff]  }
 0x5ab   : > { %v2208_v15 = vld [vmem:[%s2450_s30 + $0x30] sm:$0xff]  }
 0x5af   : > { %v1176_v16 = vpop.f32.mrb[16].mxu0 }
 0x5b0   : > { %v2097_v18 = vpop.f32.mrb[17].mxu0 }
 0x5b1   : > { %v1179_v19 = vpop.f32.mrb[18].mxu0  ;;  %v1985_v18 = vld [vmem:[%s698_s5] ss:$0 sm:$0xff] }
 0x5b2   : > { %v2098_v20 = vpop.f32.mrb[19].mxu0 }
 0x5d7   : > { %v1288_v22 = vpop.f32.mrb[20].mxu0 }
 0x5d8   : > { %v2191_v23 = vpack.i.bf16 %v1288_v22, %v1059_v12  ;;  %v2109_v24 = vpop.f32.mrb[21].mxu0  ;;  %v2205_v12 = vld [vmem:[%s2450_s30 + $0x18] sm:$0xff]  }
 0x5d9   : > { %v1291_v25 = vpop.f32.mrb[22].mxu0 }
 0x5da   : > { %2192 = vrot.lane.b32.xlu0 %v2191_v23, %s2293_s29  ;;  %v2110_v26 = vpop.f32.mrb[23].mxu0  ;;  %s2730_s29 = sld [smem:[#allocation12_spill]] (!%p2000_p5) }
 0x64c   : > { %v2193_v27 = vpop.permute.xlu0 %2192 }
 0x64d   : > { %v2195_v28 = vunpack.i.h.bf16 %v2193_v27  ;;  %v2194_v29 = vunpack.i.l.bf16 %v2193_v27 }
 0x64f   : > { %v1298_v30 = vsel %vm842_vm3, %v1176_v16, %v2195_v28  ;;  %v1069_v31 = vsel %vm842_vm3, %v947_v8, %v2194_v29  ;;  %v2209_v16 = vld [vmem:[%s2450_s30 + $0x38] sm:$0xff]  }
 0x650   : > { %v1299_v32 = vpack.c.bf16 %v1298_v30, %v1069_v31 }
 0x652   : > { %2116 = vmatmul.mubr.msk.bf16.vlgmr.msra.gmra.mrb[12].mxu1 %vm721_vm1, %v1299_v32 }
 0x653   : > { %2143 = vmatprep.mubr.msk.bf16.mxu1 %vm2287_vm2, %v2286_v17  ;;  %2128 = vmatpush3.bf16.msra.mxu1 %v2202_v9  ;;  %v2002_v9 = vld [vmem:[%s2730_s29] ss:$0 sm:$0xff] (!%p2000_p5) }
 0x654   : > { %2129 = vmatprep.subr.bf16.mxu1 %v2286_v17 }
 0x657   : > { %2130 = vmatpush3.bf16.msra.mxu1 %v2203_v10 }
 0x658   : > { %2131 = vmatprep.subr.bf16.mxu1 %v2286_v17 }
 0x65b   : > { %2132 = vmatpush3.bf16.msra.mxu1 %v2204_v11 }
 0x65c   : > { %2133 = vmatprep.subr.bf16.mxu1 %v2286_v17 }
 0x65f   : > { %2134 = vmatpush3.bf16.msra.mxu1 %v2205_v12 }
 0x660   : > { %2135 = vmatprep.subr.bf16.mxu1 %v2286_v17 }
 0x663   : > { %2136 = vmatpush3.bf16.msra.mxu1 %v2206_v13 }
 0x664   : > { %2137 = vmatprep.subr.bf16.mxu1 %v2286_v17 }
 0x667   : > { %2138 = vmatpush3.bf16.msra.mxu1 %v2207_v14  ;;  %v1662_v14 = vld [vmem:[%s2731_s18] sm:$0x3] (!%p2000_p5) }
 0x668   : > { %2139 = vmatprep.subr.bf16.mxu1 %v2286_v17 }
 0x66b   : > { %2140 = vmatpush3.bf16.msra.mxu1 %v2208_v15  ;;  %v2243_v15 = vld [vmem:[%s2706_s16 + $0x8] sm:$0xff] (!%p2000_p5)  }
 0x66c   : > { %2141 = vmatprep.subr.bf16.mxu1 %v2286_v17 }
 0x66f   : > { %2142 = vmatpush3.bf16.msra.mxu1 %v2209_v16 }
 0x725   : > { %v1360_v34 = vpop.f32.mrb[12].mxu1 }
 0x726   : > { %v1361_v35 = vadd.f32 %v1979_v33, %v1360_v34  ;;  %v2117_v36 = vpop.f32.mrb[13].mxu1 }
 0x727   : > { %v1363_v37 = vpop.f32.mrb[14].mxu1 }
 0x728   : > { %v2586_v38 = vadd.f32 %v1361_v35, %v2463_v2  ;;  %v1364_v39 = vadd.f32 %v1979_v33, %v1363_v37  ;;  %v2118_v40 = vpop.f32.mrb[15].mxu1  ;;  %v1991_v37 = vld [vmem:[%s706_s20] ss:$0 sm:$0xff] }
 0x72a   : > { %v2589_v42 = vadd.f32 %v1364_v39, %v2465_v3  ;;  %v1371_v43 = vsel %vm721_vm1, %v2586_v38, 0.0 }
 0x72b   : > { %1372 = vadd.xlane.f32.xlu1 %v1371_v43 }
 0x72c   : > { %v1374_v45 = vsel %vm721_vm1, %v2589_v42, 0.0 }
 0x72d   : > { %1375 = vadd.xlane.f32.xlu0 %v1374_v45 }
 0x7b8   : > { %v1373_v46 = vpop.xlane.xlu1 %1372 }
 0x7b9   : > { %v1377_v47 = vmul.f32 0.03125, %v1373_v46 }
 0x7ba   : > { %v1376_v48 = vpop.xlane.xlu0 %1375 }
 0x7bb   : > { %v1379_v2 = vsub.f32 %v2586_v38, %v1377_v47  ;;  %v1378_v49 = vmul.f32 0.03125, %v1376_v48 }
 0x7bd   : > { %v1380_v50 = vsub.f32 %v2589_v42, %v1378_v49  ;;  %v1381_v3 = vmul.f32 %v1379_v2, %v1379_v2 }
 0x7bf   : > { %v1383_v51 = vsel %vm721_vm1, %v1381_v3, 0.0  ;;  %v1382_v52 = vmul.f32 %v1380_v50, %v1380_v50 }
 0x7c0   : > { %1384 = vadd.xlane.f32.xlu0 %v1383_v51 }
 0x7c1   : > { %v1386_v41 = vsel %vm721_vm1, %v1382_v52, 0.0 }
 0x7c4   : > { %1387 = vadd.xlane.f32.xlu0 %v1386_v41 }
 0x84d   : > { %v1385_v55 = vpop.xlane.xlu0 %1384 }
 0x84e   : > { %v1389_v44 = vmul.f32 0.03125, %v1385_v55 }
 0x850   : > { %v1391_v56 = vadd.f32 1e-05, %v1389_v44 }
 0x851   : > { %v1388_v57 = vpop.xlane.xlu0 %1387 }
 0x852   : > { %2230 = vrsqrt.f32 %v1391_v56  ;;  %v1390_v58 = vmul.f32 0.03125, %v1388_v57  ;;  %v2294_v56 = vmov (!%p2000_p5), 0.0|0.0   ;;  %v2296_v57 = vmov (!%p2000_p5), 0.0  }
 0x853   : > { %2162 = vmatprep.subr.bf16.mxu0 (!%p2000_p5), %v2294_v56  ;;  %2154 = vmatprep.subr.bf16.mxu1 (!%p2000_p5), %v2296_v57 }
 0x854   : > { %v1392_v59 = vadd.f32 1e-05, %v1390_v58  ;;  %v2242_v58 = vld [vmem:[%s2706_s16] sm:$0xff] (!%p2000_p5)  }
 0x856   : > { %2232 = vrsqrt.f32 %v1392_v59 }
 0x85c   : > { %v2231_v60 = vpop.eup %2230 }
 0x85d   : > { %v1395_v61 = vmul.f32 %v2231_v60, %v1379_v2 }
 0x85f   : > { %v1403_v0 = vmul.f32 %v1983_v62, %v1395_v61 }
 0x860   : > { %v2233_v63 = vpop.eup %2232 }
 0x861   : > { %v1396_v1 = vmul.f32 %v2233_v63, %v1380_v50  ;;  %v1411_v6 = vadd.f32 %v1984_v4, %v1403_v0 }
 0x863   : > { %v1404_v5 = vmul.f32 %v1983_v62, %v1396_v1 }
 0x865   : > { %v1412_v7 = vadd.f32 %v1984_v4, %v1404_v5  ;;  %v2001_v5 = vld [vmem:[%s2729_s28] ss:$0 sm:$0xff] (!%p2000_p5) }
 0x867   : > { %v1413_v8 = vpack.c.bf16 %v1412_v7, %v1411_v6 }
 0x869   : > { %2124 = vmatmul.mubr.msk.bf16.vlgmr.msra.gmra.mrb[24].mxu0 %vm721_vm1, %v1413_v8 }
 0x86a   : > { %2151 = vmatprep.mubr.msk.f32.mxu0 (!%p2000_p5), %vm2295_vm7, %v2296_v57 }
 0x93c   : > { %v1474_v19 = vpop.f32.mrb[24].mxu0 }
 0x93d   : > { %v1475_v20 = vadd.f32 %v1985_v18, %v1474_v19  ;;  %v2125_v21 = vpop.f32.mrb[25].mxu0 }
 0x93e   : > { %v1477_v22 = vpop.f32.mrb[26].mxu0 }
 0x93f   : > { %v1989_v23 = vmul.f32 -1.702, %v1475_v20  ;;  %v1478_v24 = vadd.f32 %v1985_v18, %v1477_v22  ;;  %v2126_v25 = vpop.f32.mrb[27].mxu0 }
 0x941   : > { %v1485_v26 = vmul.f32 1.442695, %v1989_v23  ;;  %v1990_v27 = vmul.f32 -1.702, %v1478_v24 }
 0x943   : > { %2234 = vpow2.f32 %v1485_v26  ;;  %v1487_v28 = vmul.f32 1.442695, %v1990_v27 }
 0x945   : > { %2236 = vpow2.f32 %v1487_v28 }
 0x94d   : > { %v2235_v17 = vpop.eup %2234 }
 0x94e   : > { %v1489_v29 = vadd.f32 1.0, %v2235_v17 }
 0x94f   : > { %v2237_v30 = vpop.eup %2236 }
 0x950   : > { %2238 = vrcp.f32 %v1489_v29  ;;  %v1490_v31 = vadd.f32 1.0, %v2237_v30 }
 0x952   : > { %2240 = vrcp.f32 %v1490_v31 }
 0x95a   : > { %v2239_v32 = vpop.eup %2238 }
 0x95b   : > { %v1495_v34 = vmul.f32 %v2239_v32, %v1475_v20 }
 0x95c   : > { %v2241_v33 = vpop.eup %2240 }
 0x95d   : > { %v1496_v35 = vmul.f32 %v2241_v33, %v1478_v24 }
 0x95f   : > { %v1497_v36 = vpack.c.bf16 %v1496_v35, %v1495_v34 }
 0x961   : > { %2144 = vmatmul.mubr.bf16.vlgmr.msra.gmra.mrb[16].mxu1 %v1497_v36 }
 0x962   : > { %2158 = vmatprep.mubr.msk.bf16.mxu1 (!%p2000_p5), %vm2295_vm7, %v2296_v57  ;;  %2155 = vmatpush3.bf16.msra.mxu1 (!%p2000_p5), %v2242_v58 }
 0x963   : > { %2156 = vmatprep.subr.bf16.mxu1 (!%p2000_p5), %v2296_v57 }
 0x966   : > { %2157 = vmatpush3.bf16.msra.mxu1 (!%p2000_p5), %v2243_v15 }
 0xa34   : > { %v1603_v39 = vpop.f32.mrb[16].mxu1 }
 0xa35   : > { %v1604_v40 = vadd.f32 %v1991_v37, %v1603_v39  ;;  %v2145_v43 = vpop.f32.mrb[17].mxu1  ;;  %1617 = sbr.rel (%p2000_p5) target bundleno = 3368 (0xd28), region = 96 }
 0xa36   : > { %v1606_v45 = vpop.f32.mrb[18].mxu1 }
 0xa37   : > { %v1610_v46 = vadd.f32 %v1604_v40, %v2586_v38  ;;  %v1607_v47 = vadd.f32 %v1991_v37, %v1606_v45  ;;  %v2146_v48 = vpop.f32.mrb[19].mxu1 }
 0xa39   : > { %1612 = vst.msk [vmem:[#allocation2] sm:$0xff] %vm721_vm1, %v1610_v46  ;;  %v1611_v2 = vadd.f32 %v1607_v47, %v2589_v42  ;;  %v1620_v49 = vsel (!%p2000_p5), %vm721_vm1, %v1610_v46, 0.0 }
 0xa3a   : > { %1621 = vadd.xlane.f32.xlu0 (!%p2000_p5), %v1620_v49 }
 0xa3b   : > { %1613 = vst.msk [vmem:[#allocation2 + $0x8] sm:$0xff] %vm721_vm1, %v1611_v2  ;;  %v1623_v50 = vsel (!%p2000_p5), %vm721_vm1, %v1611_v2, 0.0 }
 0xa3e   : > { %1624 = vadd.xlane.f32.xlu0 %v1623_v50 }
 0xac7   : > { %v1622_v3 = vpop.xlane.xlu0 %1621 }
 0xac8   : > { %v1626_v51 = vmul.f32 0.03125, %v1622_v3 }
 0xaca   : > { %v1628_v38 = vsub.f32 %v1610_v46, %v1626_v51 }
 0xacb   : > { %v1625_v52 = vpop.xlane.xlu0 %1624 }
 0xacc   : > { %v1627_v41 = vmul.f32 0.03125, %v1625_v52  ;;  %v1630_v53 = vmul.f32 %v1628_v38, %v1628_v38 }
 0xace   : > { %v1629_v54 = vsub.f32 %v1611_v2, %v1627_v41  ;;  %v1632_v42 = vsel %vm721_vm1, %v1630_v53, 0.0 }
 0xacf   : > { %1633 = vadd.xlane.f32.xlu1 %v1632_v42 }
 0xad0   : > { %v1631_v55 = vmul.f32 %v1629_v54, %v1629_v54 }
 0xad2   : > { %v1635_v44 = vsel %vm721_vm1, %v1631_v55, 0.0 }
 0xad3   : > { %1636 = vadd.xlane.f32.xlu1 %v1635_v44 }
 0xb5c   : > { %v1634_v59 = vpop.xlane.xlu1 %1633 }
 0xb5d   : > { %v1638_v60 = vmul.f32 0.03125, %v1634_v59 }
 0xb5f   : > { %v1640_v61 = vadd.f32 1e-05, %v1638_v60 }
 0xb60   : > { %v1637_v62 = vpop.xlane.xlu1 %1636 }
 0xb61   : > { %2244 = vrsqrt.f32 %v1640_v61  ;;  %v1639_v63 = vmul.f32 0.03125, %v1637_v62 }
 0xb63   : > { %v1641_v0 = vadd.f32 1e-05, %v1639_v63 }
 0xb65   : > { %2246 = vrsqrt.f32 %v1641_v0 }
 0xb6b   : > { %v2245_v1 = vpop.eup %2244 }
 0xb6c   : > { %v1644_v4 = vmul.f32 %v2245_v1, %v1628_v38 }
 0xb6e   : > { %v1652_v8 = vmul.f32 %v2001_v5, %v1644_v4 }
 0xb6f   : > { %v2247_v6 = vpop.eup %2246 }
 0xb70   : > { %v1645_v7 = vmul.f32 %v2247_v6, %v1629_v54  ;;  %v1660_v11 = vadd.f32 %v2002_v9, %v1652_v8 }
 0xb72   : > { %v1653_v10 = vmul.f32 %v2001_v5, %v1645_v7 }
 0xb74   : > { %v1661_v12 = vadd.f32 %v2002_v9, %v1653_v10 }
 0xb76   : > { %v2163_v13 = vpack.c.bf16 %v1661_v12, %v1660_v11 }
 0xb78   : > { %2164 = vmatpush3.bf16.msra.mxu0 %v2163_v13 }
 0xb7b   : > { %2152 = vmatmul.mubr.msk.f32.vlgmr.msra.gmra.mrb[0].mxu0 %vm842_vm3, %v1662_v14 }
 0xc4e   : > { %v1732_v16 = vpop.f32.mrb[0].mxu0 }
 0xc4f   : > { %v1736_v18 = vpack.c.bf16 %v1732_v16, %v1732_v16  ;;  %v2153_v19 = vpop.f32.mrb[1].mxu0 }
 0xc51   : > { %2159 = vmatmul.mubr.msk.bf16.vlgmr.msra.gmra.mrb[0].mxu1 %vm721_vm1, %v1736_v18 }
 0xd24   : > { %v1790_v20 = vpop.f32.mrb[0].mxu1 }
 0xd25   : > { %1797 = vst.msk [vmem:[#allocation3] sm:$0x3] %vm1796_vm8, %v1790_v20  ;;  %v2160_v21 = vpop.f32.mrb[1].mxu1 }
 0xd26   : > { %v1793_v22 = vpop.f32.mrb[2].mxu1 }
 0xd27   : > { %v2161_v23 = vpop.f32.mrb[3].mxu1 }
 0xd28 PF: > { %p2169_p6 = scmp.eq.s32.totalorder %s2394_s25, 1  ;;  %s2297_s3 = smov [#allocation3]  }
 0xd29   : > { %s1805_s27 = sshll.u32 %s2297_s3, 4  ;;  %s1806_s27 = int_to_ptr.vmem [resolvable:$true] %s1805_s27 }
 0xd2a   : > { %s2248_s14 = scalar_lea.vmem %s1806_s27, 32  ;;  %p2255_p10 = scmp.lt.s32.totalorder %s1806_s27, %s1806_s27 }
 0xd2b   : > { %p2249_p7 = scmp.ne.s32.totalorder %s1806_s27, %s2248_s14  ;;  %p2256_p11 = scmp.lt.s32.totalorder %s2248_s14, %s2248_s14 }
 0xd2d   : > { %p2250_p8 = pnand %p2249_p7, %p2169_p6  ;;  %p2257_p12 = por %p2256_p11, %p2255_p10 }
 0xd2f   : > { %p2251_p9 = pneg %p2250_p8 }
 0xd31   : > { %p2258_p13 = pnand %p2257_p12, %p2251_p9 }
 0xd33   : > { %2261 = shalt.err (!%p2258_p13)
}
 0xd34   : > { %s2732_s30 = sld [smem:[#allocation14_spill]] }
 0xd3a   : > { %s2262_s26 = scalar_lea.hbm %s2732_s30, 32 }
 0xd3b   : > { %p2263_p0 = scmp.ne.s32.totalorder %s2732_s30, %s2262_s26  ;;  %p2268_p3 = scmp.lt.u32.totalorder %s2262_s26, %s2732_s30 }
 0xd3d   : > { %p2264_p1 = pnand %p2263_p0, %p2169_p6 }
 0xd3f   : > { %p2265_p2 = pneg %p2264_p1 }
 0xd41   : > { %p2270_p4 = pnand %p2268_p3, %p2265_p2 }
 0xd43   : > { %2273 = shalt.err (!%p2270_p4)
}
 0xd44   : > { %2166 = dma.vmem_to_hbm [thread:$0]  (%p2169_p6), %s1806_s27, 32, %s2732_s30, [#allocation4]  }
 0xd45   : > { %2279 = dma.done.wait (%p2169_p6), [#allocation4], 32  }
 0xd46   : > { %2281 = vsyncadd (%p2169_p6), [#allocation4], 4294967264 }
 0xd47 PF: > { %s2733_s29 = sld [smem:[#allocation6_spill]] }
 0xd4d   : > { %s28_s24 = sadd.s32 1, %s2733_s29  }
 0xd4e   : > { %p25_p5 = scmp.ge.s32.totalorder %s28_s24, 4  }
 0xd50   :  { %27 = sbr.rel (!%p25_p5) target bundleno = 10 (0xa), region = 156 }
 0xd57   :  { %1818 = vsyncpa [#allocation4], 1 }
 0xd58   :  { %1820 = vsyncpa [#allocation4 + $0x1], 1 }

</bundles_post_ra>
